<compile_context>
chip_gen: v7x
topology: tpu7x:2x2x1
jax: 0.10.0
libtpu: 0.0.40
codegen_flags: <defaults>
</compile_context>

<pallas_src>
import math

import jax
import jax.numpy as jnp
from jax.experimental import pallas as pl
from jax.experimental.pallas import tpu as pltpu

N_TASKS = 17
ENC_HIDDEN = 32
DEC_HIDDEN = 8
BN_EPS = 1e-5


# ---------------------------------------------------------------------------
# Counter-based PRNG (int32-only VPU ops + EUP transcendentals).  Shared by
# the kernel and the pure-JAX reference so noise streams match exactly.
# Keyed on (global batch index, latent-pair index, seed) -> tile-invariant.
# ---------------------------------------------------------------------------
def _fmix32(x):
    """murmur3 finalizer on int32 (logical shifts emulated via mask)."""
    x = x ^ ((x >> 16) & jnp.int32(0xFFFF))
    x = x * jnp.int32(-2048144789)          # 0x85EBCA6B
    x = x ^ ((x >> 13) & jnp.int32(0x7FFFF))
    x = x * jnp.int32(-1028477387)          # 0xC2B2AE35
    x = x ^ ((x >> 16) & jnp.int32(0xFFFF))
    return x


def _hash_uniform(b_idx, l_idx, seed, salt):
    """U(0,1), strictly inside (0, 1), from int32 element coordinates."""
    x = (b_idx * jnp.int32(-1640531527)     # 0x9E3779B9
         + l_idx * jnp.int32(40503)
         + seed * jnp.int32(1000003)
         + jnp.int32(salt))
    h = _fmix32(x ^ jnp.int32(salt))
    m = h & jnp.int32(0x7FFFFF)             # 23 random bits
    return (m.astype(jnp.float32) + jnp.float32(0.5)) * jnp.float32(1.0 / (1 << 23))


def _gaussian_pair(b_idx, l_idx, seed):
    """Two independent N(0,1) draws per coordinate via one Box-Muller pair."""
    u1 = _hash_uniform(b_idx, l_idx, seed, 0x243F6A)
    u2 = _hash_uniform(b_idx, l_idx, seed, 0x13198A)
    r = jnp.sqrt(jnp.float32(-2.0) * jnp.log(u1))
    theta = jnp.float32(2.0 * math.pi) * u2
    # sin(theta) == cos(theta - pi/2); reuse cos (known-good EUP lowering).
    return r * jnp.cos(theta), r * jnp.cos(theta - jnp.float32(0.5 * math.pi))


# ---------------------------------------------------------------------------
# Kernel: one batch tile (features x tb, batch on lanes) -> full VAE forward.
# ---------------------------------------------------------------------------
def _vae_kernel(seed_ref,
                x_ref,
                w1_ref, b1_ref, w2_ref, b2_ref,
                wml_ref, bml_ref,
                wd1_ref, bd1_ref, wd2_ref, bd2_ref, wd3_ref, bd3_ref,
                out_ref):
    f32 = jnp.float32
    x = x_ref[...]                                                # (in, tb)

    # --- Encoder (BatchNorm folded into fc1 by the wrapper; dropout = id) ---
    h = jnp.tanh(jnp.dot(w1_ref[...], x, preferred_element_type=f32) + b1_ref[...])
    h = jnp.maximum(
        jnp.dot(w2_ref[...], h, preferred_element_type=f32) + b2_ref[...], 0.0)

    # Fused [z_mean ; z_log_var] matmul, split on the (cheap) sublane axis.
    zc = jnp.dot(wml_ref[...], h, preferred_element_type=f32) + bml_ref[...]
    latent = wml_ref.shape[0] // 2
    z_mean = zc[:latent, :]
    z_log_var = zc[latent:, :]

    # --- Sampling epilogue: z = mu + exp(log_var / 2) * eps -----------------
    tb = x.shape[1]
    half = (latent + 1) // 2
    b_idx = (jax.lax.broadcasted_iota(jnp.int32, (half, tb), 1)
             + pl.program_id(0) * tb)       # global batch index -> tile-invariant
    l_idx = jax.lax.broadcasted_iota(jnp.int32, (half, tb), 0)
    eps_a, eps_b = _gaussian_pair(b_idx, l_idx, seed_ref[0])
    eps = jnp.concatenate([eps_a, eps_b], axis=0)[:latent, :]
    z = z_mean + jnp.exp(f32(0.5) * z_log_var) * eps

    # --- 17 task decoders fused into three dense matmuls --------------------
    d = jnp.maximum(
        jnp.dot(wd1_ref[...], z, preferred_element_type=f32) + bd1_ref[...], 0.0)
    d = jnp.maximum(
        jnp.dot(wd2_ref[...], d, preferred_element_type=f32) + bd2_ref[...], 0.0)
    y = jnp.dot(wd3_ref[...], d, preferred_element_type=f32) + bd3_ref[...]
    out_ref[...] = y.astype(out_ref.dtype)                       # (17, tb), lane-dense


# ---------------------------------------------------------------------------
# Parameter init / packing (wrapper-side, plain JAX, done once).
# ---------------------------------------------------------------------------
def init_vae_params(key, input_size, latent_dim, n_tasks=N_TASKS):
    ks = jax.random.split(key, 18)
    n = jax.random.normal
    return {
        # BatchNorm1d (eval-mode running stats + affine).
        "bn_gamma": 1.0 + 0.1 * n(ks[0], (input_size,), jnp.float32),
        "bn_beta": 0.1 * n(ks[1], (input_size,), jnp.float32),
        "bn_mean": 0.1 * n(ks[2], (input_size,), jnp.float32),
        "bn_var": 1.0 + 0.1 * jnp.abs(n(ks[3], (input_size,), jnp.float32)),
        # Encoder linears, stored in (in, out) orientation.
        "w_fc1": n(ks[4], (input_size, ENC_HIDDEN), jnp.float32) / math.sqrt(input_size),
        "b_fc1": 0.1 * n(ks[5], (ENC_HIDDEN,), jnp.float32),
        "w_fc2": n(ks[6], (ENC_HIDDEN, ENC_HIDDEN), jnp.float32) / math.sqrt(ENC_HIDDEN),
        "b_fc2": 0.1 * n(ks[7], (ENC_HIDDEN,), jnp.float32),
        "w_mean": n(ks[8], (ENC_HIDDEN, latent_dim), jnp.float32) / math.sqrt(ENC_HIDDEN),
        "b_mean": 0.1 * n(ks[9], (latent_dim,), jnp.float32),
        "w_lvar": n(ks[10], (ENC_HIDDEN, latent_dim), jnp.float32) / math.sqrt(ENC_HIDDEN),
        "b_lvar": 0.1 * n(ks[11], (latent_dim,), jnp.float32),
        # Per-task decoders (n_tasks stacked), (in, out) orientation.
        "w_d1": n(ks[12], (n_tasks, latent_dim, DEC_HIDDEN), jnp.float32) / math.sqrt(latent_dim),
        "b_d1": 0.1 * n(ks[13], (n_tasks, DEC_HIDDEN), jnp.float32),
        "w_d2": n(ks[14], (n_tasks, DEC_HIDDEN, DEC_HIDDEN), jnp.float32) / math.sqrt(DEC_HIDDEN),
        "b_d2": 0.1 * n(ks[15], (n_tasks, DEC_HIDDEN), jnp.float32),
        "w_d3": n(ks[16], (n_tasks, DEC_HIDDEN, 1), jnp.float32) / math.sqrt(DEC_HIDDEN),
        "b_d3": 0.1 * n(ks[17], (n_tasks, 1), jnp.float32),
    }


def _pack_params(p, latent_dim, n_tasks):
    """Fold BN into fc1, stack the 17 decoders, transpose everything so the
    kernel computes W^T @ activation with batch on the lane axis."""
    scale = p["bn_gamma"] / jnp.sqrt(p["bn_var"] + BN_EPS)
    shift = p["bn_beta"] - p["bn_mean"] * scale
    w1 = (p["w_fc1"] * scale[:, None]).T                                   # (32, in)
    b1 = (p["b_fc1"] + shift @ p["w_fc1"]).reshape(-1, 1)                  # (32, 1)

    w2 = p["w_fc2"].T                                                      # (32, 32)
    b2 = p["b_fc2"].reshape(-1, 1)

    # Fused [z_mean ; z_log_var] head.
    wml = jnp.concatenate([p["w_mean"], p["w_lvar"]], axis=1).T            # (2L, 32)
    bml = jnp.concatenate([p["b_mean"], p["b_lvar"]]).reshape(-1, 1)       # (2L, 1)

    # 17 decoders: stacked / block-diagonal / block-structured, transposed.
    wd1 = p["w_d1"].transpose(1, 0, 2).reshape(latent_dim, n_tasks * DEC_HIDDEN).T  # (136, L)
    bd1 = p["b_d1"].reshape(-1, 1)                                         # (136, 1)
    wd2 = jax.scipy.linalg.block_diag(*[p["w_d2"][t].T for t in range(n_tasks)])    # (136, 136)
    bd2 = p["b_d2"].reshape(-1, 1)
    wd3 = jax.scipy.linalg.block_diag(*[p["w_d3"][t] for t in range(n_tasks)]).T    # (17, 136)
    bd3 = p["b_d3"].reshape(-1, 1)                                         # (17, 1)

    return (w1, b1, w2, b2, wml, bml, wd1, bd1, wd2, bd2, wd3, bd3)


def vae_forward(x, params, seed=0, *, latent_dim, block_rows=2048):
    """Pallas equivalent of VAE(input_size, latent_dim, output_size).forward(x)."""
    B, input_size = x.shape
    n_tasks = params["w_d1"].shape[0]
    packed = _pack_params(params, latent_dim, n_tasks)

    # Batch lives on the lane axis.  Lane tiles must be a multiple of 128 when
    # the batch is tiled; split small/medium batches into >= 2 tiles so the
    # "parallel" grid axis can shard across v7x's two TensorCores.
    block_rows = max(128, (block_rows // 128) * 128)
    if B > block_rows:
        tb = block_rows
    else:
        half = ((-(-B // 2) + 127) // 128) * 128
        tb = half if half < B else B
    grid = (pl.cdiv(B, tb),)
    seed_arr = jnp.asarray([seed], dtype=jnp.int32)

    def fixed_spec(a):
        return pl.BlockSpec(a.shape, lambda i, s: (0,) * a.ndim)

    in_specs = [pl.BlockSpec((input_size, tb), lambda i, s: (0, i))]
    in_specs += [fixed_spec(a) for a in packed]

    y_t = pl.pallas_call(
        _vae_kernel,
        out_shape=jax.ShapeDtypeStruct((n_tasks, B), x.dtype),
        grid_spec=pltpu.PrefetchScalarGridSpec(
            num_scalar_prefetch=1,
            grid=grid,
            in_specs=in_specs,
            out_specs=pl.BlockSpec((n_tasks, tb), lambda i, s: (0, i)),
        ),
        compiler_params=pltpu.CompilerParams(
            dimension_semantics=("parallel",),      # shard batch tiles across TCs
            vmem_limit_bytes=32 * 1024 * 1024,      # lift v5e's 16 MiB default
        ),
    )(seed_arr, x.T, *packed)
    return y_t.T


# ---------------------------------------------------------------------------
# Pure-JAX reference (raw per-task weights, same counter-based noise).
# ---------------------------------------------------------------------------
def vae_reference(x, p, seed, latent_dim):
    scale = p["bn_gamma"] / jnp.sqrt(p["bn_var"] + BN_EPS)
    xb = (x - p["bn_mean"]) * scale + p["bn_beta"]
    h = jnp.tanh(xb @ p["w_fc1"] + p["b_fc1"])
    h = jax.nn.relu(h @ p["w_fc2"] + p["b_fc2"])
    z_mean = h @ p["w_mean"] + p["b_mean"]
    z_log_var = h @ p["w_lvar"] + p["b_lvar"]

    B = x.shape[0]
    half = (latent_dim + 1) // 2
    b_idx = jax.lax.broadcasted_iota(jnp.int32, (B, half), 0)
    l_idx = jax.lax.broadcasted_iota(jnp.int32, (B, half), 1)
    eps_a, eps_b = _gaussian_pair(b_idx, l_idx, jnp.int32(seed))
    eps = jnp.concatenate([eps_a, eps_b], axis=1)[:, :latent_dim]
    z = z_mean + jnp.exp(0.5 * z_log_var) * eps

    ys = []
    for t in range(p["w_d1"].shape[0]):
        d = jax.nn.relu(z @ p["w_d1"][t] + p["b_d1"][t])
        d = jax.nn.relu(d @ p["w_d2"][t] + p["b_d2"][t])
        ys.append(d @ p["w_d3"][t] + p["b_d3"][t])
    return jnp.concatenate(ys, axis=1)


if __name__ == "__main__":
    key = jax.random.PRNGKey(0)
    kx, kp, kx2 = jax.random.split(key, 3)
    input_size, latent_dim = 32, 16
    params = init_vae_params(kp, input_size, latent_dim)

    # Small single-tile smoke test.
    B = 8
    x = jax.random.normal(kx, (B, input_size), dtype=jnp.float32)
    y = jax.block_until_ready(vae_forward(x, params, seed=42, latent_dim=latent_dim))
    assert y.shape == (B, N_TASKS), y.shape
    assert y.dtype == jnp.float32
    assert bool(jnp.all(jnp.isfinite(y)))
    y_ref = vae_reference(x, params, 42, latent_dim)
    err = float(jnp.max(jnp.abs(y - y_ref)))
    assert err < 5e-2, f"kernel/reference mismatch: max abs err = {err}"

    # Multi-tile path (grid > 1, partial last lane-tile) to exercise tiling.
    B2 = 300
    x2 = jax.random.normal(kx2, (B2, input_size), dtype=jnp.float32)
    y2 = jax.block_until_ready(vae_forward(x2, params, seed=7, latent_dim=latent_dim))
    assert y2.shape == (B2, N_TASKS)
    y2_ref = vae_reference(x2, params, 7, latent_dim)
    err2 = float(jnp.max(jnp.abs(y2 - y2_ref)))
    assert err2 < 5e-2, f"kernel/reference mismatch (tiled): max abs err = {err2}"

    print("KERNEL_OK")
</pallas_src>

<mosaic_0001>
module attributes {stable_mosaic.version = 11 : i64} {
  func.func @_vae_kernel(%arg0: i32, %arg1: memref<1xi32, #tpu.memory_space<smem>>, %arg2: memref<32x8xf32, #tpu.memory_space<vmem>>, %arg3: memref<32x32xf32, #tpu.memory_space<vmem>>, %arg4: memref<32x1xf32, #tpu.memory_space<vmem>>, %arg5: memref<32x32xf32, #tpu.memory_space<vmem>>, %arg6: memref<32x1xf32, #tpu.memory_space<vmem>>, %arg7: memref<32x32xf32, #tpu.memory_space<vmem>>, %arg8: memref<32x1xf32, #tpu.memory_space<vmem>>, %arg9: memref<136x16xf32, #tpu.memory_space<vmem>>, %arg10: memref<136x1xf32, #tpu.memory_space<vmem>>, %arg11: memref<136x136xf32, #tpu.memory_space<vmem>>, %arg12: memref<136x1xf32, #tpu.memory_space<vmem>>, %arg13: memref<17x136xf32, #tpu.memory_space<vmem>>, %arg14: memref<17x1xf32, #tpu.memory_space<vmem>>, %arg15: memref<17x8xf32, #tpu.memory_space<vmem>>) attributes {dimension_semantics = [#tpu.dimension_semantics<parallel>], iteration_bounds = array<i64: 1>, scalar_prefetch = 1 : i64, scratch_operands = 0 : i64, tpu.core_type = #tpu.core_type<tc>, window_params = [{transform_indices = @transform_0, window_bounds = array<i64: 32, 8>}, {pipeline_mode = #tpu.pipeline_mode<synchronous>, transform_indices = @transform_1, window_bounds = array<i64: 32, 32>}, {pipeline_mode = #tpu.pipeline_mode<synchronous>, transform_indices = @transform_2, window_bounds = array<i64: 32, 1>}, {pipeline_mode = #tpu.pipeline_mode<synchronous>, transform_indices = @transform_3, window_bounds = array<i64: 32, 32>}, {pipeline_mode = #tpu.pipeline_mode<synchronous>, transform_indices = @transform_4, window_bounds = array<i64: 32, 1>}, {pipeline_mode = #tpu.pipeline_mode<synchronous>, transform_indices = @transform_5, window_bounds = array<i64: 32, 32>}, {pipeline_mode = #tpu.pipeline_mode<synchronous>, transform_indices = @transform_6, window_bounds = array<i64: 32, 1>}, {pipeline_mode = #tpu.pipeline_mode<synchronous>, transform_indices = @transform_7, window_bounds = array<i64: 136, 16>}, {pipeline_mode = #tpu.pipeline_mode<synchronous>, transform_indices = @transform_8, window_bounds = array<i64: 136, 1>}, {pipeline_mode = #tpu.pipeline_mode<synchronous>, transform_indices = @transform_9, window_bounds = array<i64: 136, 136>}, {pipeline_mode = #tpu.pipeline_mode<synchronous>, transform_indices = @transform_10, window_bounds = array<i64: 136, 1>}, {pipeline_mode = #tpu.pipeline_mode<synchronous>, transform_indices = @transform_11, window_bounds = array<i64: 17, 136>}, {pipeline_mode = #tpu.pipeline_mode<synchronous>, transform_indices = @transform_12, window_bounds = array<i64: 17, 1>}, {transform_indices = @transform_13, window_bounds = array<i64: 17, 8>}]} {
    %c0 = arith.constant 0 : index
    %c0_0 = arith.constant 0 : index
    %0 = vector.load %arg2[%c0, %c0_0] : memref<32x8xf32, #tpu.memory_space<vmem>>, vector<32x8xf32>
    %c0_1 = arith.constant 0 : index
    %c0_2 = arith.constant 0 : index
    %1 = vector.load %arg3[%c0_1, %c0_2] : memref<32x32xf32, #tpu.memory_space<vmem>>, vector<32x32xf32>
    %cst = arith.constant dense<0.000000e+00> : vector<32x8xf32>
    %2 = tpu.matmul %1, %0, %cst {dimension_numbers = #tpu.dot_dimension_numbers<[1], [0], [0], [1], [0, 0, 1, 1], [], []>} : vector<32x32xf32>, vector<32x8xf32>, vector<32x8xf32> -> vector<32x8xf32>
    %c0_3 = arith.constant 0 : index
    %c0_4 = arith.constant 0 : index
    %3 = vector.load %arg4[%c0_3, %c0_4] : memref<32x1xf32, #tpu.memory_space<vmem>>, vector<32x1xf32>
    %4 = vector.broadcast %3 : vector<32x1xf32> to vector<32x8xf32>
    %5 = arith.addf %2, %4 : vector<32x8xf32>
    %6 = math.tanh %5 : vector<32x8xf32>
    %c0_5 = arith.constant 0 : index
    %c0_6 = arith.constant 0 : index
    %7 = vector.load %arg5[%c0_5, %c0_6] : memref<32x32xf32, #tpu.memory_space<vmem>>, vector<32x32xf32>
    %cst_7 = arith.constant dense<0.000000e+00> : vector<32x8xf32>
    %8 = tpu.matmul %7, %6, %cst_7 {dimension_numbers = #tpu.dot_dimension_numbers<[1], [0], [0], [1], [0, 0, 1, 1], [], []>} : vector<32x32xf32>, vector<32x8xf32>, vector<32x8xf32> -> vector<32x8xf32>
    %c0_8 = arith.constant 0 : index
    %c0_9 = arith.constant 0 : index
    %9 = vector.load %arg6[%c0_8, %c0_9] : memref<32x1xf32, #tpu.memory_space<vmem>>, vector<32x1xf32>
    %10 = vector.broadcast %9 : vector<32x1xf32> to vector<32x8xf32>
    %11 = arith.addf %8, %10 : vector<32x8xf32>
    %cst_10 = arith.constant 0.000000e+00 : f32
    %12 = vector.broadcast %cst_10 : f32 to vector<32x8xf32>
    %13 = arith.maximumf %11, %12 : vector<32x8xf32>
    %c0_11 = arith.constant 0 : index
    %c0_12 = arith.constant 0 : index
    %14 = vector.load %arg7[%c0_11, %c0_12] : memref<32x32xf32, #tpu.memory_space<vmem>>, vector<32x32xf32>
    %cst_13 = arith.constant dense<0.000000e+00> : vector<32x8xf32>
    %15 = tpu.matmul %14, %13, %cst_13 {dimension_numbers = #tpu.dot_dimension_numbers<[1], [0], [0], [1], [0, 0, 1, 1], [], []>} : vector<32x32xf32>, vector<32x8xf32>, vector<32x8xf32> -> vector<32x8xf32>
    %c0_14 = arith.constant 0 : index
    %c0_15 = arith.constant 0 : index
    %16 = vector.load %arg8[%c0_14, %c0_15] : memref<32x1xf32, #tpu.memory_space<vmem>>, vector<32x1xf32>
    %17 = vector.broadcast %16 : vector<32x1xf32> to vector<32x8xf32>
    %18 = arith.addf %15, %17 : vector<32x8xf32>
    %19 = vector.extract_strided_slice %18 {offsets = [0, 0], sizes = [16, 8], strides = [1, 1]} : vector<32x8xf32> to vector<16x8xf32>
    %20 = vector.extract_strided_slice %18 {offsets = [16, 0], sizes = [16, 8], strides = [1, 1]} : vector<32x8xf32> to vector<16x8xf32>
    %21 = tpu.iota {dimensions = array<i32: 1>} : vector<8x8xi32>
    %c8_i32 = arith.constant 8 : i32
    %22 = arith.muli %arg0, %c8_i32 : i32
    %23 = vector.broadcast %22 : i32 to vector<8x8xi32>
    %24 = arith.addi %21, %23 : vector<8x8xi32>
    %25 = tpu.iota {dimensions = array<i32: 0>} : vector<8x8xi32>
    %c0_16 = arith.constant 0 : index
    %26 = memref.load %arg1[%c0_16] : memref<1xi32, #tpu.memory_space<smem>>
    %c-1640531527_i32 = arith.constant -1640531527 : i32
    %27 = vector.broadcast %c-1640531527_i32 : i32 to vector<8x8xi32>
    %28 = arith.muli %24, %27 : vector<8x8xi32>
    %c40503_i32 = arith.constant 40503 : i32
    %29 = vector.broadcast %c40503_i32 : i32 to vector<8x8xi32>
    %30 = arith.muli %25, %29 : vector<8x8xi32>
    %31 = arith.addi %28, %30 : vector<8x8xi32>
    %c1000003_i32 = arith.constant 1000003 : i32
    %32 = arith.muli %26, %c1000003_i32 : i32
    %33 = vector.broadcast %32 : i32 to vector<8x8xi32>
    %34 = arith.addi %31, %33 : vector<8x8xi32>
    %c2375530_i32 = arith.constant 2375530 : i32
    %35 = vector.broadcast %c2375530_i32 : i32 to vector<8x8xi32>
    %36 = arith.addi %34, %35 : vector<8x8xi32>
    %c2375530_i32_17 = arith.constant 2375530 : i32
    %37 = vector.broadcast %c2375530_i32_17 : i32 to vector<8x8xi32>
    %38 = arith.xori %36, %37 : vector<8x8xi32>
    %c16_i32 = arith.constant 16 : i32
    %39 = vector.broadcast %c16_i32 : i32 to vector<8x8xi32>
    %40 = arith.shrsi %38, %39 : vector<8x8xi32>
    %c65535_i32 = arith.constant 65535 : i32
    %41 = vector.broadcast %c65535_i32 : i32 to vector<8x8xi32>
    %42 = arith.andi %40, %41 : vector<8x8xi32>
    %43 = arith.xori %38, %42 : vector<8x8xi32>
    %c-2048144789_i32 = arith.constant -2048144789 : i32
    %44 = vector.broadcast %c-2048144789_i32 : i32 to vector<8x8xi32>
    %45 = arith.muli %43, %44 : vector<8x8xi32>
    %c13_i32 = arith.constant 13 : i32
    %46 = vector.broadcast %c13_i32 : i32 to vector<8x8xi32>
    %47 = arith.shrsi %45, %46 : vector<8x8xi32>
    %c524287_i32 = arith.constant 524287 : i32
    %48 = vector.broadcast %c524287_i32 : i32 to vector<8x8xi32>
    %49 = arith.andi %47, %48 : vector<8x8xi32>
    %50 = arith.xori %45, %49 : vector<8x8xi32>
    %c-1028477387_i32 = arith.constant -1028477387 : i32
    %51 = vector.broadcast %c-1028477387_i32 : i32 to vector<8x8xi32>
    %52 = arith.muli %50, %51 : vector<8x8xi32>
    %c16_i32_18 = arith.constant 16 : i32
    %53 = vector.broadcast %c16_i32_18 : i32 to vector<8x8xi32>
    %54 = arith.shrsi %52, %53 : vector<8x8xi32>
    %c65535_i32_19 = arith.constant 65535 : i32
    %55 = vector.broadcast %c65535_i32_19 : i32 to vector<8x8xi32>
    %56 = arith.andi %54, %55 : vector<8x8xi32>
    %57 = arith.xori %52, %56 : vector<8x8xi32>
    %c8388607_i32 = arith.constant 8388607 : i32
    %58 = vector.broadcast %c8388607_i32 : i32 to vector<8x8xi32>
    %59 = arith.andi %57, %58 : vector<8x8xi32>
    %60 = arith.sitofp %59 : vector<8x8xi32> to vector<8x8xf32>
    %cst_20 = arith.constant 5.000000e-01 : f32
    %61 = vector.broadcast %cst_20 : f32 to vector<8x8xf32>
    %62 = arith.addf %60, %61 : vector<8x8xf32>
    %cst_21 = arith.constant 1.1920929E-7 : f32
    %63 = vector.broadcast %cst_21 : f32 to vector<8x8xf32>
    %64 = arith.mulf %62, %63 : vector<8x8xf32>
    %c-1640531527_i32_22 = arith.constant -1640531527 : i32
    %65 = vector.broadcast %c-1640531527_i32_22 : i32 to vector<8x8xi32>
    %66 = arith.muli %24, %65 : vector<8x8xi32>
    %c40503_i32_23 = arith.constant 40503 : i32
    %67 = vector.broadcast %c40503_i32_23 : i32 to vector<8x8xi32>
    %68 = arith.muli %25, %67 : vector<8x8xi32>
    %69 = arith.addi %66, %68 : vector<8x8xi32>
    %c1000003_i32_24 = arith.constant 1000003 : i32
    %70 = arith.muli %26, %c1000003_i32_24 : i32
    %71 = vector.broadcast %70 : i32 to vector<8x8xi32>
    %72 = arith.addi %69, %71 : vector<8x8xi32>
    %c1251722_i32 = arith.constant 1251722 : i32
    %73 = vector.broadcast %c1251722_i32 : i32 to vector<8x8xi32>
    %74 = arith.addi %72, %73 : vector<8x8xi32>
    %c1251722_i32_25 = arith.constant 1251722 : i32
    %75 = vector.broadcast %c1251722_i32_25 : i32 to vector<8x8xi32>
    %76 = arith.xori %74, %75 : vector<8x8xi32>
    %c16_i32_26 = arith.constant 16 : i32
    %77 = vector.broadcast %c16_i32_26 : i32 to vector<8x8xi32>
    %78 = arith.shrsi %76, %77 : vector<8x8xi32>
    %c65535_i32_27 = arith.constant 65535 : i32
    %79 = vector.broadcast %c65535_i32_27 : i32 to vector<8x8xi32>
    %80 = arith.andi %78, %79 : vector<8x8xi32>
    %81 = arith.xori %76, %80 : vector<8x8xi32>
    %c-2048144789_i32_28 = arith.constant -2048144789 : i32
    %82 = vector.broadcast %c-2048144789_i32_28 : i32 to vector<8x8xi32>
    %83 = arith.muli %81, %82 : vector<8x8xi32>
    %c13_i32_29 = arith.constant 13 : i32
    %84 = vector.broadcast %c13_i32_29 : i32 to vector<8x8xi32>
    %85 = arith.shrsi %83, %84 : vector<8x8xi32>
    %c524287_i32_30 = arith.constant 524287 : i32
    %86 = vector.broadcast %c524287_i32_30 : i32 to vector<8x8xi32>
    %87 = arith.andi %85, %86 : vector<8x8xi32>
    %88 = arith.xori %83, %87 : vector<8x8xi32>
    %c-1028477387_i32_31 = arith.constant -1028477387 : i32
    %89 = vector.broadcast %c-1028477387_i32_31 : i32 to vector<8x8xi32>
    %90 = arith.muli %88, %89 : vector<8x8xi32>
    %c16_i32_32 = arith.constant 16 : i32
    %91 = vector.broadcast %c16_i32_32 : i32 to vector<8x8xi32>
    %92 = arith.shrsi %90, %91 : vector<8x8xi32>
    %c65535_i32_33 = arith.constant 65535 : i32
    %93 = vector.broadcast %c65535_i32_33 : i32 to vector<8x8xi32>
    %94 = arith.andi %92, %93 : vector<8x8xi32>
    %95 = arith.xori %90, %94 : vector<8x8xi32>
    %c8388607_i32_34 = arith.constant 8388607 : i32
    %96 = vector.broadcast %c8388607_i32_34 : i32 to vector<8x8xi32>
    %97 = arith.andi %95, %96 : vector<8x8xi32>
    %98 = arith.sitofp %97 : vector<8x8xi32> to vector<8x8xf32>
    %cst_35 = arith.constant 5.000000e-01 : f32
    %99 = vector.broadcast %cst_35 : f32 to vector<8x8xf32>
    %100 = arith.addf %98, %99 : vector<8x8xf32>
    %cst_36 = arith.constant 1.1920929E-7 : f32
    %101 = vector.broadcast %cst_36 : f32 to vector<8x8xf32>
    %102 = arith.mulf %100, %101 : vector<8x8xf32>
    %103 = math.log %64 : vector<8x8xf32>
    %cst_37 = arith.constant -2.000000e+00 : f32
    %104 = vector.broadcast %cst_37 : f32 to vector<8x8xf32>
    %105 = arith.mulf %104, %103 : vector<8x8xf32>
    %106 = math.sqrt %105 : vector<8x8xf32>
    %cst_38 = arith.constant 6.28318548 : f32
    %107 = vector.broadcast %cst_38 : f32 to vector<8x8xf32>
    %108 = arith.mulf %107, %102 : vector<8x8xf32>
    %109 = math.cos %108 : vector<8x8xf32>
    %110 = arith.mulf %106, %109 : vector<8x8xf32>
    %cst_39 = arith.constant 1.57079637 : f32
    %111 = vector.broadcast %cst_39 : f32 to vector<8x8xf32>
    %112 = arith.subf %108, %111 : vector<8x8xf32>
    %113 = math.cos %112 : vector<8x8xf32>
    %114 = arith.mulf %106, %113 : vector<8x8xf32>
    %115 = tpu.concatenate %110, %114 in 0 : vector<8x8xf32>, vector<8x8xf32> -> vector<16x8xf32>
    %cst_40 = arith.constant 5.000000e-01 : f32
    %116 = vector.broadcast %cst_40 : f32 to vector<16x8xf32>
    %117 = arith.mulf %116, %20 : vector<16x8xf32>
    %118 = math.exp %117 : vector<16x8xf32>
    %119 = arith.mulf %118, %115 : vector<16x8xf32>
    %120 = arith.addf %19, %119 : vector<16x8xf32>
    %c0_41 = arith.constant 0 : index
    %c0_42 = arith.constant 0 : index
    %121 = vector.load %arg9[%c0_41, %c0_42] : memref<136x16xf32, #tpu.memory_space<vmem>>, vector<136x16xf32>
    %cst_43 = arith.constant dense<0.000000e+00> : vector<136x8xf32>
    %122 = tpu.matmul %121, %120, %cst_43 {dimension_numbers = #tpu.dot_dimension_numbers<[1], [0], [0], [1], [0, 0, 1, 1], [], []>} : vector<136x16xf32>, vector<16x8xf32>, vector<136x8xf32> -> vector<136x8xf32>
    %c0_44 = arith.constant 0 : index
    %c0_45 = arith.constant 0 : index
    %123 = vector.load %arg10[%c0_44, %c0_45] : memref<136x1xf32, #tpu.memory_space<vmem>>, vector<136x1xf32>
    %124 = vector.broadcast %123 : vector<136x1xf32> to vector<136x8xf32>
    %125 = arith.addf %122, %124 : vector<136x8xf32>
    %cst_46 = arith.constant 0.000000e+00 : f32
    %126 = vector.broadcast %cst_46 : f32 to vector<136x8xf32>
    %127 = arith.maximumf %125, %126 : vector<136x8xf32>
    %c0_47 = arith.constant 0 : index
    %c0_48 = arith.constant 0 : index
    %128 = vector.load %arg11[%c0_47, %c0_48] : memref<136x136xf32, #tpu.memory_space<vmem>>, vector<136x136xf32>
    %cst_49 = arith.constant dense<0.000000e+00> : vector<136x8xf32>
    %129 = tpu.matmul %128, %127, %cst_49 {dimension_numbers = #tpu.dot_dimension_numbers<[1], [0], [0], [1], [0, 0, 1, 1], [], []>} : vector<136x136xf32>, vector<136x8xf32>, vector<136x8xf32> -> vector<136x8xf32>
    %c0_50 = arith.constant 0 : index
    %c0_51 = arith.constant 0 : index
    %130 = vector.load %arg12[%c0_50, %c0_51] : memref<136x1xf32, #tpu.memory_space<vmem>>, vector<136x1xf32>
    %131 = vector.broadcast %130 : vector<136x1xf32> to vector<136x8xf32>
    %132 = arith.addf %129, %131 : vector<136x8xf32>
    %cst_52 = arith.constant 0.000000e+00 : f32
    %133 = vector.broadcast %cst_52 : f32 to vector<136x8xf32>
    %134 = arith.maximumf %132, %133 : vector<136x8xf32>
    %c0_53 = arith.constant 0 : index
    %c0_54 = arith.constant 0 : index
    %135 = vector.load %arg13[%c0_53, %c0_54] : memref<17x136xf32, #tpu.memory_space<vmem>>, vector<17x136xf32>
    %cst_55 = arith.constant dense<0.000000e+00> : vector<17x8xf32>
    %136 = tpu.matmul %135, %134, %cst_55 {dimension_numbers = #tpu.dot_dimension_numbers<[1], [0], [0], [1], [0, 0, 1, 1], [], []>} : vector<17x136xf32>, vector<136x8xf32>, vector<17x8xf32> -> vector<17x8xf32>
    %c0_56 = arith.constant 0 : index
    %c0_57 = arith.constant 0 : index
    %137 = vector.load %arg14[%c0_56, %c0_57] : memref<17x1xf32, #tpu.memory_space<vmem>>, vector<17x1xf32>
    %138 = vector.broadcast %137 : vector<17x1xf32> to vector<17x8xf32>
    %139 = arith.addf %136, %138 : vector<17x8xf32>
    %c0_58 = arith.constant 0 : index
    %c0_59 = arith.constant 0 : index
    %140 = vector.load %arg15[%c0_58, %c0_59] : memref<17x8xf32, #tpu.memory_space<vmem>>, vector<17x8xf32>
    tpu.vector_store %arg15[%c0_58, %c0_59], %139 {strides = array<i32>} : memref<17x8xf32, #tpu.memory_space<vmem>>, vector<17x8xf32>,
    return
  }
  func.func @transform_0(%arg0: i32, %arg1: memref<1xi32, #tpu.memory_space<smem>>) -> (i32, i32) {
    %c0_i32 = arith.constant 0 : i32
    %c0_i32_0 = arith.constant 0 : i32
    return %c0_i32, %arg0 : i32, i32
  }
  func.func @transform_1(%arg0: i32, %arg1: memref<1xi32, #tpu.memory_space<smem>>) -> (i32, i32) {
    %c0_i32 = arith.constant 0 : i32
    %c0_i32_0 = arith.constant 0 : i32
    %c0_i32_1 = arith.constant 0 : i32
    return %c0_i32, %c0_i32_0 : i32, i32
  }
  func.func @transform_2(%arg0: i32, %arg1: memref<1xi32, #tpu.memory_space<smem>>) -> (i32, i32) {
    %c0_i32 = arith.constant 0 : i32
    %c0_i32_0 = arith.constant 0 : i32
    %c0_i32_1 = arith.constant 0 : i32
    return %c0_i32, %c0_i32_0 : i32, i32
  }
  func.func @transform_3(%arg0: i32, %arg1: memref<1xi32, #tpu.memory_space<smem>>) -> (i32, i32) {
    %c0_i32 = arith.constant 0 : i32
    %c0_i32_0 = arith.constant 0 : i32
    %c0_i32_1 = arith.constant 0 : i32
    return %c0_i32, %c0_i32_0 : i32, i32
  }
  func.func @transform_4(%arg0: i32, %arg1: memref<1xi32, #tpu.memory_space<smem>>) -> (i32, i32) {
    %c0_i32 = arith.constant 0 : i32
    %c0_i32_0 = arith.constant 0 : i32
    %c0_i32_1 = arith.constant 0 : i32
    return %c0_i32, %c0_i32_0 : i32, i32
  }
  func.func @transform_5(%arg0: i32, %arg1: memref<1xi32, #tpu.memory_space<smem>>) -> (i32, i32) {
    %c0_i32 = arith.constant 0 : i32
    %c0_i32_0 = arith.constant 0 : i32
    %c0_i32_1 = arith.constant 0 : i32
    return %c0_i32, %c0_i32_0 : i32, i32
  }
  func.func @transform_6(%arg0: i32, %arg1: memref<1xi32, #tpu.memory_space<smem>>) -> (i32, i32) {
    %c0_i32 = arith.constant 0 : i32
    %c0_i32_0 = arith.constant 0 : i32
    %c0_i32_1 = arith.constant 0 : i32
    return %c0_i32, %c0_i32_0 : i32, i32
  }
  func.func @transform_7(%arg0: i32, %arg1: memref<1xi32, #tpu.memory_space<smem>>) -> (i32, i32) {
    %c0_i32 = arith.constant 0 : i32
    %c0_i32_0 = arith.constant 0 : i32
    %c0_i32_1 = arith.constant 0 : i32
    return %c0_i32, %c0_i32_0 : i32, i32
  }
  func.func @transform_8(%arg0: i32, %arg1: memref<1xi32, #tpu.memory_space<smem>>) -> (i32, i32) {
    %c0_i32 = arith.constant 0 : i32
    %c0_i32_0 = arith.constant 0 : i32
    %c0_i32_1 = arith.constant 0 : i32
    return %c0_i32, %c0_i32_0 : i32, i32
  }
  func.func @transform_9(%arg0: i32, %arg1: memref<1xi32, #tpu.memory_space<smem>>) -> (i32, i32) {
    %c0_i32 = arith.constant 0 : i32
    %c0_i32_0 = arith.constant 0 : i32
    %c0_i32_1 = arith.constant 0 : i32
    return %c0_i32, %c0_i32_0 : i32, i32
  }
  func.func @transform_10(%arg0: i32, %arg1: memref<1xi32, #tpu.memory_space<smem>>) -> (i32, i32) {
    %c0_i32 = arith.constant 0 : i32
    %c0_i32_0 = arith.constant 0 : i32
    %c0_i32_1 = arith.constant 0 : i32
    return %c0_i32, %c0_i32_0 : i32, i32
  }
  func.func @transform_11(%arg0: i32, %arg1: memref<1xi32, #tpu.memory_space<smem>>) -> (i32, i32) {
    %c0_i32 = arith.constant 0 : i32
    %c0_i32_0 = arith.constant 0 : i32
    %c0_i32_1 = arith.constant 0 : i32
    return %c0_i32, %c0_i32_0 : i32, i32
  }
  func.func @transform_12(%arg0: i32, %arg1: memref<1xi32, #tpu.memory_space<smem>>) -> (i32, i32) {
    %c0_i32 = arith.constant 0 : i32
    %c0_i32_0 = arith.constant 0 : i32
    %c0_i32_1 = arith.constant 0 : i32
    return %c0_i32, %c0_i32_0 : i32, i32
  }
  func.func @transform_13(%arg0: i32, %arg1: memref<1xi32, #tpu.memory_space<smem>>) -> (i32, i32) {
    %c0_i32 = arith.constant 0 : i32
    %c0_i32_0 = arith.constant 0 : i32
    return %c0_i32, %arg0 : i32, i32
  }
}

</mosaic_0001>

<bundles_post_ra>
// kernel: tpu_custom_call.1
= control target key start
LH: loop header
LB: loop body
LE: loop exit
PB: predicated region body
PF: predicated region fallthrough
CT: control target
= control target key end

     0   :  { %v1849_v0 = vmov 0   ;;  %vm78_vm0 = vcmask 261120   ;;  %vm1857_vm11 = vmmov 0   ;;  %s2577_s3 = inlined_call_operand.vmem [shape: f32[32,1], index: 3, kind: input, shape index: {}]   ;;  %s2578_s1 = inlined_call_operand.vmem [shape: f32[32,8], index: 1, kind: input, shape index: {}]   ;;  %s2579_s2 = inlined_call_operand.vmem [shape: f32[32,32], index: 2, kind: input, shape index: {}]   ;;  %s2580_s5 = inlined_call_operand.vmem [shape: f32[32,1], index: 5, kind: input, shape index: {}]   ;;  %s2581_s7 = inlined_call_operand.vmem [shape: f32[32,1], index: 7, kind: input, shape index: {}]   ;;  %s2582_s9 = inlined_call_operand.vmem [shape: f32[136,1], index: 9, kind: input, shape index: {}]   ;;  %s2583_s11 = inlined_call_operand.vmem [shape: f32[136,1], index: 11, kind: input, shape index: {}]   ;;  %s2584_s13 = inlined_call_operand.vmem [shape: f32[17,1], index: 13, kind: input, shape index: {}]   ;;  %s2585_s4 = inlined_call_operand.vmem [shape: f32[32,32], index: 4, kind: input, shape index: {}]   ;;  %s2586_s6 = inlined_call_operand.vmem [shape: f32[32,32], index: 6, kind: input, shape index: {}]   ;;  %s2587_s0 = inlined_call_operand.<no memory space> [shape: s32[1], index: 0, kind: input, shape index: {}]   ;;  %s2588_s8 = inlined_call_operand.vmem [shape: f32[136,16], index: 8, kind: input, shape index: {}]   ;;  %s2589_s10 = inlined_call_operand.vmem [shape: f32[136,136], index: 10, kind: input, shape index: {}]   ;;  %s2590_s12 = inlined_call_operand.vmem [shape: f32[17,136], index: 12, kind: input, shape index: {}]   ;;  %s2591_s14 = inlined_call_operand.vmem [shape: f32[17,8], index: 14, kind: output, shape index: {}]  }
   0x1   :  { %1823 = vset.pattern.permute.xlu0 %v1849_v0  ;;  %v54_v1 = vld [vmem:[%s2577_s3] sm:$0xff]  ;;  %1824 = vset.pattern.permute.xlu1 %v1849_v0  ;;  %v47_v3 = vld [vmem:[%s2578_s1 + $0x8] sm:$0xff]  ;;  %v56_v5 = vld [vmem:[%s2577_s3 + $0x10] sm:$0xff]  ;;  %s445_s15 = smul.u32 1000003, %s2587_s0 }
   0x2   :  { %v46_v2 = vld [vmem:[%s2578_s1] sm:$0xff]  ;;  %60 = vperm.xlu0 %1823, %v54_v1   ;;  %v48_v6 = vld [vmem:[%s2578_s1 + $0x10] sm:$0xff]  ;;  %70 = vperm.xlu1 %1824, %v56_v5   ;;  %v55_v7 = vld [vmem:[%s2577_s3 + $0x8] sm:$0xff] }
   0x3   :  { %v1730_v4 = vpack.c.bf16 %v47_v3, %v46_v2  ;;  %v49_v8 = vld [vmem:[%s2578_s1 + $0x18] sm:$0xff]  ;;  %v50_v11 = vld [vmem:[%s2579_s2] sm:$0xff]  ;;  %v185_v13 = vld [vmem:[%s2580_s5 + $0x8] sm:$0xff] }
   0x4   :  { %v1734_v9 = vpack.c.bf16 %v49_v8, %v48_v6  ;;  %v57_v10 = vld [vmem:[%s2577_s3 + $0x18] sm:$0xff]  ;;  %1641 = vmatprep.mubr.msk.f32.mxu1 %vm78_vm0, %v50_v11  ;;  %v184_v12 = vld [vmem:[%s2580_s5] sm:$0xff]  ;;  %v51_v14 = vld [vmem:[%s2579_s2 + $0x8] sm:$0xff] }
   0x5   :  { %1731 = vmatprep.subr.bf16.mxu1 %v1730_v4  ;;  %v52_v15 = vld [vmem:[%s2579_s2 + $0x10] sm:$0xff]  ;;  %v187_v17 = vld [vmem:[%s2580_s5 + $0x18] sm:$0xff]  ;;  %v313_v21 = vld [vmem:[%s2581_s7] sm:$0xff] }
   0x6   :  { %1733 = vmatpush3.bf16.msra.mxu1 %v1730_v4  ;;  %65 = vperm.xlu0 %1823, %v55_v7   ;;  %v186_v16 = vld [vmem:[%s2580_s5 + $0x10] sm:$0xff]  ;;  %v53_v18 = vld [vmem:[%s2579_s2 + $0x18] sm:$0xff]  ;;  %v314_v22 = vld [vmem:[%s2581_s7 + $0x8] sm:$0xff] }
   0x7   :  { %1735 = vmatprep.subr.bf16.mxu1 %v1734_v9  ;;  %75 = vperm.xlu1 %1824, %v57_v10   ;;  %v315_v19 = vld [vmem:[%s2581_s7 + $0x10] sm:$0xff]  ;;  %v316_v20 = vld [vmem:[%s2581_s7 + $0x18] sm:$0xff]  ;;  %v729_v23 = vld [vmem:[%s2582_s9] sm:$0xff] }
   0x8   :  { %v730_v24 = vld [vmem:[%s2582_s9 + $0x8] sm:$0xff]  ;;  %v731_v25 = vld [vmem:[%s2582_s9 + $0x10] sm:$0xff]  ;;  %v732_v26 = vld [vmem:[%s2582_s9 + $0x18] sm:$0xff] }
   0x9   :  { %v733_v27 = vld [vmem:[%s2582_s9 + $0x20] sm:$0xff]  ;;  %v734_v28 = vld [vmem:[%s2582_s9 + $0x28] sm:$0xff]  ;;  %v735_v29 = vld [vmem:[%s2582_s9 + $0x30] sm:$0xff] }
   0xa   :  { %1737 = vmatpush3.bf16.msra.mxu1 %v1734_v9  ;;  %190 = vperm.xlu0 %1823, %v184_v12   ;;  %v736_v30 = vld [vmem:[%s2582_s9 + $0x38] sm:$0xff]  ;;  %v737_v31 = vld [vmem:[%s2582_s9 + $0x40] sm:$0xff]  ;;  %v738_v32 = vld [vmem:[%s2582_s9 + $0x48] sm:$0xff] }
   0xb   :  { %195 = vperm.xlu1 %1824, %v185_v13   ;;  %v739_v33 = vld [vmem:[%s2582_s9 + $0x50] sm:$0xff]  ;;  %v740_v34 = vld [vmem:[%s2582_s9 + $0x58] sm:$0xff]  ;;  %v741_v35 = vld [vmem:[%s2582_s9 + $0x60] sm:$0xff] }
   0xc   :  { %v742_v36 = vld [vmem:[%s2582_s9 + $0x68] sm:$0xff]  ;;  %v743_v37 = vld [vmem:[%s2582_s9 + $0x70] sm:$0xff]  ;;  %v744_v38 = vld [vmem:[%s2582_s9 + $0x78] sm:$0xff] }
   0xd   :  { %1642 = vmatmul.mubr.msk.f32.vlgmr.msra.gmra.mrb[0].mxu1 %vm78_vm0, %v51_v14  ;;  %v745_v39 = vld [vmem:[%s2582_s9 + $0x80] sm:$0xff]  ;;  %v1085_v41 = vld [vmem:[%s2583_s11 + $0x8] sm:$0xff]  ;;  %v1086_v42 = vld [vmem:[%s2583_s11 + $0x10] sm:$0xff] }
   0xe   :  { %1644 = vmatprep.mubr.msk.f32.mxu1 %vm78_vm0, %v52_v15  ;;  %200 = vperm.xlu0 %1823, %v186_v16   ;;  %v1084_v40 = vld [vmem:[%s2583_s11] sm:$0xff]  ;;  %v1087_v43 = vld [vmem:[%s2583_s11 + $0x18] sm:$0xff]  ;;  %v1089_v45 = vld [vmem:[%s2583_s11 + $0x28] sm:$0xff] }
   0xf   :  { %205 = vperm.xlu1 %1824, %v187_v17   ;;  %v1088_v44 = vld [vmem:[%s2583_s11 + $0x20] sm:$0xff]  ;;  %v1090_v46 = vld [vmem:[%s2583_s11 + $0x30] sm:$0xff]  ;;  %v1091_v47 = vld [vmem:[%s2583_s11 + $0x38] sm:$0xff] }
  0x10   :  { %v1092_v48 = vld [vmem:[%s2583_s11 + $0x40] sm:$0xff]  ;;  %v1093_v49 = vld [vmem:[%s2583_s11 + $0x48] sm:$0xff]  ;;  %v1094_v50 = vld [vmem:[%s2583_s11 + $0x50] sm:$0xff] }
  0x11   :  { %1645 = vmatmul.mubr.msk.f32.gmra.mrb[2].mxu1 %vm78_vm0, %v53_v18  ;;  %v1095_v51 = vld [vmem:[%s2583_s11 + $0x58] sm:$0xff]  ;;  %v1096_v52 = vld [vmem:[%s2583_s11 + $0x60] sm:$0xff]  ;;  %v1097_v53 = vld [vmem:[%s2583_s11 + $0x68] sm:$0xff] }
  0x12   :  { %329 = vperm.xlu0 %1823, %v315_v19   ;;  %v1098_v54 = vld [vmem:[%s2583_s11 + $0x70] sm:$0xff]  ;;  %v1099_v55 = vld [vmem:[%s2583_s11 + $0x78] sm:$0xff]  ;;  %v1100_v56 = vld [vmem:[%s2583_s11 + $0x80] sm:$0xff]  ;;  %v434_v19 = vlaneseq }
  0x13   :  { %334 = vperm.xlu1 %1824, %v316_v20   ;;  %v1411_v57 = vld [vmem:[%s2584_s13] sm:$0xff]  ;;  %v1412_v58 = vld [vmem:[%s2584_s13 + $0x8] sm:$0xff]  ;;  %v1413_v59 = vld [vmem:[%s2584_s13 + $0x10] sm:$0x1] }
  0x14   :  { %v180_v60 = vld [vmem:[%s2585_s4] sm:$0xff]  ;;  %v181_v15 = vld [vmem:[%s2585_s4 + $0x8] sm:$0xff]  ;;  %v182_v16 = vld [vmem:[%s2585_s4 + $0x10] sm:$0xff] }
  0x15   :  { %1655 = vmatprep.mubr.msk.f32.mxu1 %vm78_vm0, %v180_v60  ;;  %v183_v17 = vld [vmem:[%s2585_s4 + $0x18] sm:$0xff]  ;;  %v309_v18 = vld [vmem:[%s2586_s6] sm:$0xff] }
  0x16   :  { %319 = vperm.xlu0 %1823, %v313_v21   ;;  %1669 = vmatprep.mubr.msk.f32.mxu0 %vm78_vm0, %v309_v18 }
  0x17   :  { %324 = vperm.xlu1 %1824, %v314_v22  }
  0x1a   :  { %748 = vperm.xlu0 %1823, %v729_v23   ;;  %v435_v23 = vand.u32 127, %v434_v19 }
  0x1b   :  { %753 = vperm.xlu1 %1824, %v730_v24   ;;  %v440_v24 = vshrl.u32 %v434_v19, 7 }
  0x1e   :  { %758 = vperm.xlu0 %1823, %v731_v25  }
  0x1f   :  { %763 = vperm.xlu1 %1824, %v732_v26  }
  0x22   :  { %768 = vperm.xlu0 %1823, %v733_v27  }
  0x23   :  { %773 = vperm.xlu1 %1824, %v734_v28  }
  0x26   :  { %778 = vperm.xlu0 %1823, %v735_v29  }
  0x27   :  { %783 = vperm.xlu1 %1824, %v736_v30  }
  0x2a   :  { %788 = vperm.xlu0 %1823, %v737_v31  }
  0x2b   :  { %793 = vperm.xlu1 %1824, %v738_v32   ;;  %v442_v32 = vmul.u32 2654435769, %v435_v23 }
  0x2e   :  { %798 = vperm.xlu0 %1823, %v739_v33   ;;  %v443_v33 = vmul.u32 40503, %v440_v24  ;;  %v1853_v24 = vmov 2475754826  }
  0x2f   :  { %803 = vperm.xlu1 %1824, %v740_v34  }
  0x32   :  { %808 = vperm.xlu0 %1823, %v741_v35  }
  0x33   :  { %813 = vperm.xlu1 %1824, %v742_v36  }
  0x36   :  { %818 = vperm.xlu0 %1823, %v743_v37  }
  0x37   :  { %823 = vperm.xlu1 %1824, %v744_v38  }
  0x3a   :  { %828 = vperm.xlu0 %1823, %v745_v39  }
  0x3b   :  { %1103 = vperm.xlu1 %1824, %v1084_v40  }
  0x3e   :  { %1108 = vperm.xlu0 %1823, %v1085_v41   ;;  %v444_v41 = vadd.s32 %v443_v33, %v442_v32  ;;  %v1855_v32 = vmov 1326507024  }
  0x3f   :  { %1113 = vperm.xlu1 %1824, %v1086_v42   ;;  %v446_v42 = vstv %s445_s15 }
  0x42   :  { %1118 = vperm.xlu0 %1823, %v1087_v43  }
  0x43   :  { %1123 = vperm.xlu1 %1824, %v1088_v44   ;;  %v2132_v44 = vadd.s32 %v446_v42, %v444_v41 }
  0x46   :  { %1128 = vperm.xlu0 %1823, %v1089_v45   ;;  %v310_v45 = vld [vmem:[%s2586_s6 + $0x8] sm:$0xff] }
  0x47   :  { %1133 = vperm.xlu1 %1824, %v1090_v46   ;;  %v311_v46 = vld [vmem:[%s2586_s6 + $0x10] sm:$0xff] }
  0x4a   :  { %1138 = vperm.xlu0 %1823, %v1091_v47   ;;  %v465_v47 = vadd.s32 1251722, %v2132_v44 }
  0x4b   :  { %1143 = vperm.xlu1 %1824, %v1092_v48   ;;  %v312_v48 = vld [vmem:[%s2586_s6 + $0x18] sm:$0xff] }
  0x4e   :  { %1148 = vperm.xlu0 %1823, %v1093_v49   ;;  %v466_v49 = vxor.u32 1251722, %v465_v47 }
  0x4f   :  { %1153 = vperm.xlu1 %1824, %v1094_v50  }
  0x50   :  { %v1541_v50 = vshrl.u32 %v466_v49, 16 }
  0x52   :  { %1158 = vperm.xlu0 %1823, %v1095_v51   ;;  %v469_v51 = vxor.u32 %v1541_v50, %v466_v49 }
  0x53   :  { %1163 = vperm.xlu1 %1824, %v1096_v52  }
  0x54   :  { %v470_v52 = vmul.u32 2246822507, %v469_v51 }
  0x56   :  { %1168 = vperm.xlu0 %1823, %v1097_v53   ;;  %v1542_v53 = vshrl.u32 %v470_v52, 13 }
  0x57   :  { %1173 = vperm.xlu1 %1824, %v1098_v54  }
  0x58   :  { %v473_v54 = vxor.u32 %v1542_v53, %v470_v52 }
  0x5a   :  { %1178 = vperm.xlu0 %1823, %v1099_v55   ;;  %v474_v55 = vmul.u32 3266489909, %v473_v54 }
  0x5b   :  { %1183 = vperm.xlu1 %1824, %v1100_v56  }
  0x5c   :  { %v1543_v56 = vshrl.u32 %v474_v55, 16 }
  0x5e   :  { %1416 = vperm.xlu0 %1823, %v1411_v57   ;;  %v477_v57 = vxor.u32 %v1543_v56, %v474_v55 }
  0x5f   :  { %1421 = vperm.xlu1 %1824, %v1412_v58  }
  0x60   :  { %v478_v58 = vand.u32 8388607, %v477_v57 }
  0x62   :  { %1426 = vperm.xlu0 %1823, %v1413_v59   ;;  %v479_v59 = vcvt.s32.f32 %v478_v58 }
  0x64   :  { %v480_v60 = vadd.f32 0.5, %v479_v59 }
  0x81   :  { %v61_v61 = vpop.permute.xlu0 %60  ;;  %v71_v62 = vpop.permute.xlu1 %70 }
  0x85   :  { %v66_v63 = vpop.permute.xlu0 %65 }
  0x86   :  { %v76_v4 = vpop.permute.xlu1 %75 }
  0x89   :  { %v191_v21 = vpop.permute.xlu0 %190 }
  0x8a   :  { %v196_v20 = vpop.permute.xlu1 %195 }
  0x8d   :  { %v201_v34 = vpop.permute.xlu0 %200 }
  0x8e   :  { %v206_v29 = vpop.permute.xlu1 %205 }
  0xe0   :  { %v1643_v0 = vpop.f32.mrb[0].mxu1 }
  0xe1   :  { %v163_v1 = vadd.f32 %v1643_v0, %v66_v63  ;;  %v157_v2 = vpop.f32.mrb[1].mxu1 }
  0xe2   :  { %v158_v3 = vadd.f32 %v157_v2, %v61_v61  ;;  %v481_v61 = vmul.f32 1.1920929e-07, %v480_v60 }
  0xe3   :  { %1825 = vtanh.f32 %v163_v1 }
  0xe4   :  { %1827 = vtanh.f32 %v158_v3  ;;  %v1646_v5 = vpop.f32.mrb[2].mxu1 }
  0xe5   :  { %v173_v6 = vadd.f32 %v1646_v5, %v76_v4  ;;  %v167_v7 = vpop.f32.mrb[3].mxu1 }
  0xe6   :  { %v168_v8 = vadd.f32 %v167_v7, %v71_v62  ;;  %v2147_v62 = vmul.f32 6.2831855, %v481_v61 }
  0xe7   :  { %1829 = vtanh.f32 %v173_v6 }
  0xe8   :  { %1831 = vtanh.f32 %v168_v8  ;;  %v2150_v63 = vadd.f32 -1.5707964, %v2147_v62  ;;  %v496_v0 = vand.u32 2139095040, %v2147_v62 }
  0xea   :  { %v601_v1 = vand.u32 2139095040, %v2150_v63  ;;  %v497_v2 = vshrl.u32 %v496_v0, 23 }
  0xec   :  { %v602_v3 = vshrl.u32 %v601_v1, 23  ;;  %v1544_v4 = vadd.s32 4294967169, %v497_v2 }
  0xed   :  { %v1826_v9 = vpop.eup %1825 }
  0xee   :  { %v1828_v10 = vpop.eup %1827  ;;  %v1549_v5 = vadd.s32 4294967169, %v602_v3  ;;  %v503_v6 = vadd.s32 1, %v1544_v4 }
  0xef   :  { %v1738_v11 = vpack.c.bf16 %v1826_v9, %v1828_v10 }
  0xf0   :  { %v608_v7 = vadd.s32 1, %v1549_v5  ;;  %vm504_vm1 = vcmp.gt.s32.totalorder %v503_v6, 0 }
  0xf1   :  { %v1830_v12 = vpop.eup %1829  ;;  %1739 = vmatprep.subr.bf16.mxu1 %v1738_v11  ;;  %v505_v8 = vsel %vm504_vm1, %v503_v6, 0  ;;  %vm600_vm1 = vcmp.lt.s32.totalorder %v2150_v63, 0 }
  0xf2   :  { %v1832_v13 = vpop.eup %1831  ;;  %1741 = vmatpush3.bf16.msra.mxu1 %v1738_v11  ;;  %vm609_vm2 = vcmp.gt.s32.totalorder %v608_v7, 0  ;;  %v507_v9 = vand.u32 31, %v505_v8 }
  0xf3   :  { %v1742_v14 = vpack.c.bf16 %v1830_v12, %v1832_v13  ;;  %v610_v10 = vsel %vm609_vm2, %v608_v7, 0  ;;  %v493_v13 = vand.u32 2147483647, %v2147_v62 }
  0xf4   :  { %v612_v11 = vand.u32 31, %v610_v10  ;;  %v2154_v12 = vsub.s32 32, %v507_v9 }
  0xf5   :  { %1743 = vmatprep.subr.bf16.mxu1 %v1742_v14  ;;  %vm2275_vm2 = vcmp.le.f32.partialorder %v493_v13, 0.7853982 }
  0xf6   :  { %1745 = vmatpush3.bf16.msra.mxu1 %v1742_v14  ;;  %v2157_v14 = vsub.s32 32, %v612_v11  ;;  %v523_v33 = vshrl.u32 %v1855_v32, %v2154_v12 }
  0xf8   :  { %v616_v42 = vshrl.u32 %v1853_v24, %v2157_v14 }
  0xf9   :  { %1656 = vmatmul.mubr.msk.f32.vlgmr.msra.gmra.mrb[4].mxu1 %vm78_vm0, %v181_v15  ;;  %v1850_v15 = vmov 2102212464  }
  0xfa   :  { %1658 = vmatprep.mubr.msk.f32.mxu1 %vm78_vm0, %v182_v16  ;;  %v519_v16 = vshll.u32 %v1850_v15, %v507_v9  ;;  %v624_v19 = vshll.u32 %v1850_v15, %v612_v11  ;;  %v622_v47 = vshrl.u32 %v1850_v15, %v2157_v14 }
  0xfd   :  { %1659 = vmatmul.mubr.msk.f32.gmra.mrb[6].mxu1 %vm78_vm0, %v183_v17  ;;  %v1851_v17 = vmov 920167782  }
  0xfe   :  { %v520_v18 = vshrl.u32 %v1851_v17, %v2154_v12 }
 0x1cc   :  { %v1657_v22 = vpop.f32.mrb[4].mxu1 }
 0x1cd   :  { %v292_v25 = vadd.f32 %v1657_v22, %v196_v20  ;;  %v286_v26 = vpop.f32.mrb[5].mxu1  ;;  %v500_v20 = vand.u32 8388607, %v493_v13  ;;  %v1852_v22 = vmov 683565275  }
 0x1ce   :  { %v287_v27 = vadd.f32 %v286_v26, %v191_v21  ;;  %v2162_v21 = vshrl.u32 %v505_v8, 5  ;;  %v510_v23 = vshll.u32 %v1852_v22, %v507_v9  ;;  %v513_v26 = vshll.u32 %v1853_v24, %v507_v9 }
 0x1cf   :  { %v306_v28 = vmax.f32 %v292_v25, 0.0  ;;  %v511_v25 = vshrl.u32 %v1853_v24, %v2154_v12  ;;  %v615_v41 = vshll.u32 %v1852_v22, %v612_v11 }
 0x1d0   :  { %v305_v30 = vmax.f32 %v287_v27, 0.0  ;;  %v1660_v31 = vpop.f32.mrb[6].mxu1  ;;  %v1854_v27 = vmov 2131351028   ;;  %vm528_vm3 = vcmp.lt.s32.totalorder %v2162_v21, 4  ;;  %vm525_vm5 = vcmp.lt.s32.totalorder %v2162_v21, 1 }
 0x1d1   :  { %v302_v35 = vadd.f32 %v1660_v31, %v206_v29  ;;  %v296_v36 = vpop.f32.mrb[7].mxu1  ;;  %v516_v29 = vshll.u32 %v1854_v27, %v507_v9  ;;  %v522_v31 = vshll.u32 %v1851_v17, %v507_v9  ;;  %v512_v51 = vor.u32 %v511_v25, %v510_v23 }
 0x1d2   :  { %v297_v37 = vadd.f32 %v296_v36, %v201_v34  ;;  %v1746_v38 = vpack.c.bf16 %v306_v28, %v305_v30  ;;  %v514_v28 = vshrl.u32 %v1854_v27, %v2154_v12  ;;  %v517_v30 = vshrl.u32 %v1850_v15, %v2154_v12 }
 0x1d3   :  { %v308_v39 = vmax.f32 %v302_v35, 0.0  ;;  %v598_v34 = vand.u32 2147483647, %v2150_v63  ;;  %v625_v35 = vshrl.u32 %v1851_v17, %v2157_v14  ;;  %v2171_v36 = vshrl.u32 %v610_v10, 5 }
 0x1d4   :  { %v307_v40 = vmax.f32 %v297_v37, 0.0  ;;  %1747 = vmatprep.subr.bf16.mxu0 %v1746_v38  ;;  %v627_v37 = vshll.u32 %v1851_v17, %v612_v11  ;;  %v524_v49 = vor.u32 %v523_v33, %v522_v31  ;;  %v515_v54 = vor.u32 %v514_v28, %v513_v26 }
 0x1d5   :  { %1749 = vmatpush3.bf16.msra.mxu0 %v1746_v38  ;;  %v628_v38 = vshrl.u32 %v1855_v32, %v2157_v14  ;;  %v626_v50 = vor.u32 %v625_v35, %v624_v19  ;;  %v605_v52 = vand.u32 8388607, %v598_v34  ;;  %vm633_vm4 = vcmp.lt.s32.totalorder %v2171_v36, 4 }
 0x1d6   :  { %v1750_v43 = vpack.c.bf16 %v308_v39, %v307_v40  ;;  %v1856_v39 = vmov 0.0|0.0   ;;  %v521_v40 = vor.u32 %v520_v18, %v519_v16  ;;  %v518_v55 = vor.u32 %v517_v30, %v516_v29 }
 0x1d7   :  { %1754 = vmatprep.subr.bf16.mxu1 %v1856_v39  ;;  %v629_v53 = vor.u32 %v628_v38, %v627_v37  ;;  %vm527_vm6 = vcmp.lt.s32.totalorder %v2162_v21, 3  ;;  %v617_v57 = vor.u32 %v616_v42, %v615_v41  ;;  %v538_v60 = vsel %vm528_vm3, %v524_v49, 1326507024 }
 0x1d8   :  { %1751 = vmatprep.subr.bf16.mxu0 %v1750_v43  ;;  %v534_v56 = vsel %vm528_vm3, %v521_v40, 920167782  ;;  %vm630_vm7 = vcmp.lt.s32.totalorder %v2171_v36, 1  ;;  %vm632_vm8 = vcmp.lt.s32.totalorder %v2171_v36, 3  ;;  %v639_v61 = vsel %vm633_vm4, %v626_v50, 920167782 }
 0x1d9   :  { %1753 = vmatpush3.bf16.msra.mxu0 %v1750_v43  ;;  %v618_v43 = vshll.u32 %v1853_v24, %v612_v11  ;;  %v606_v0 = vor.u32 8388608, %v605_v52  ;;  %v643_v1 = vsel %vm633_vm4, %v629_v53, 1326507024  ;;  %vm526_vm9 = vcmp.lt.s32.totalorder %v2162_v21, 2 }
 0x1da   :  { %1757 = vmatprep.subr.bf16.mxu0 %v1856_v39  ;;  %v533_v2 = vsel %vm525_vm5, %v512_v51, %v515_v54  ;;  %v535_v3 = vsel %vm527_vm6, %v518_v55, %v534_v56  ;;  %v537_v4 = vsel %vm525_vm5, %v515_v54, %v518_v55  ;;  %v539_v5 = vsel %vm527_vm6, %v521_v40, %v538_v60 }
 0x1db   :  { %vm631_vm10 = vcmp.lt.s32.totalorder %v2171_v36, 2  ;;  %v644_v10 = vsel %vm632_vm8, %v626_v50, %v643_v1  ;;  %v646_v15 = vshll.u32 %v606_v0, 8  ;;  %v540_v16 = vsel %vm526_vm9, %v537_v4, %v539_v5 }
 0x1dc   :  { %1670 = vmatmul.mubr.msk.f32.vlgmr.msra.gmra.mrb[0].mxu0 %vm78_vm0, %v310_v45  ;;  %v619_v45 = vshrl.u32 %v1854_v27, %v2157_v14  ;;  %v509_v18 = vshrl.u32 %v1852_v22, %v2154_v12  ;;  %v614_v25 = vshrl.u32 %v1852_v22, %v2157_v14  ;;  %v1858_v32 = vmov 0.0  }
 0x1dd   :  { %1672 = vmatprep.mubr.msk.f32.mxu0 %vm78_vm0, %v311_v46  ;;  %v621_v46 = vshll.u32 %v1854_v27, %v612_v11  ;;  %v536_v11 = vsel %vm526_vm9, %v533_v2, %v535_v3  ;;  %1679 = vmatprep.mubr.msk.f32.mxu1 %vm1857_vm11, %v1858_v32 }
 0x1de   :  { %v620_v58 = vor.u32 %v619_v45, %v618_v43  ;;  %v529_v14 = vsel %vm525_vm5, %v509_v18, %v512_v51  ;;  %v634_v33 = vsel %vm630_vm7, %v614_v25, %v617_v57 }
 0x1df   :  { %v623_v59 = vor.u32 %v622_v47, %v621_v46 }
 0x1e0   :  { %1673 = vmatmul.mubr.msk.f32.gmra.mrb[2].mxu0 %vm78_vm0, %v312_v48  ;;  %v501_v48 = vor.u32 8388608, %v500_v20  ;;  %v638_v6 = vsel %vm630_vm7, %v617_v57, %v620_v58  ;;  %v530_v20 = vsel %vm528_vm3, %v518_v55, 2102212464  ;;  %vm495_vm0 = vcmp.lt.s32.totalorder %v2147_v62, 0 }
 0x1e1   :  { %v640_v7 = vsel %vm632_vm8, %v623_v59, %v639_v61  ;;  %v642_v9 = vsel %vm630_vm7, %v620_v58, %v623_v59  ;;  %v635_v31 = vsel %vm633_vm4, %v623_v59, 2102212464  ;;  %v531_v22 = vsel %vm527_vm6, %v515_v54, %v530_v20 }
 0x1e2   :  { %v541_v8 = vshll.u32 %v501_v48, 8  ;;  %v641_v17 = vsel %vm631_vm10, %v638_v6, %v640_v7  ;;  %v645_v19 = vsel %vm631_vm10, %v642_v9, %v644_v10  ;;  %v636_v35 = vsel %vm632_vm8, %v620_v58, %v635_v31 }
 0x1e3   :  { %v2234_v28 = vmul.u32.u64.low %v646_v15, %v641_v17  ;;  %v2235_v29 = vmul.u32.u64.high %v646_v15, %v641_v17, %v2234_v28  ;;  %v2237_v30 = vmul.u32.u64.low %v646_v15, %v645_v19  ;;  %v2238_v12 = vmul.u32.u64.high %v646_v15, %v645_v19, %v2237_v30 }
 0x1e4   :  { %v2226_v23 = vmul.u32.u64.low %v541_v8, %v536_v11  ;;  %v2227_v24 = vmul.u32.u64.high %v541_v8, %v536_v11, %v2226_v23  ;;  %v2231_v26 = vmul.u32.u64.low %v541_v8, %v540_v16  ;;  %v2232_v27 = vmul.u32.u64.high %v541_v8, %v540_v16, %v2231_v26 }
 0x1e5   :  { %v532_v37 = vsel %vm526_vm9, %v529_v14, %v531_v22  ;;  %v637_v40 = vsel %vm631_vm10, %v634_v33, %v636_v35  ;;  %v656_v41 = vadd.s32 1, %v2235_v29  ;;  %vm655_vm13 = vc.u32 %v2238_v12, %v2234_v28 }
 0x1e6   :  { %v551_v38 = vadd.s32 1, %v2227_v24  ;;  %vm550_vm12 = vc.u32 %v2232_v27, %v2226_v23  ;;  %v548_v42 = vmul.u32 %v541_v8, %v532_v37  ;;  %v653_v45 = vmul.u32 %v646_v15, %v637_v40 }
 0x1e7   :  { %v657_v46 = vsel %vm655_vm13, %v656_v41, %v2235_v29  ;;  %v448_v48 = vadd.s32 2375530, %v2132_v44  ;;  %v549_v18 = vadd.s32 %v2226_v23, %v2232_v27  ;;  %vm2283_vm3 = vcmp.le.f32.partialorder %v598_v34, 0.7853982 }
 0x1e8   :  { %v552_v43 = vsel %vm550_vm12, %v551_v38, %v2227_v24  ;;  %v658_v21 = vadd.s32 %v657_v46, %v653_v45  ;;  %v654_v24 = vadd.s32 %v2234_v28, %v2238_v12  ;;  %vm690_vm13 = vweird.f32 %v2150_v63 }
 0x1e9   :  { %v553_v47 = vadd.s32 %v552_v43, %v548_v42  ;;  %v449_v51 = vxor.u32 2375530, %v448_v48 }
 0x1ea   :  { %v659_v50 = vadd.s32 536870912, %v658_v21 }
 0x1eb   :  { %v554_v49 = vadd.s32 536870912, %v553_v47  ;;  %v1538_v53 = vshrl.u32 %v449_v51, 16 }
 0x1ec   :  { %v2265_v36 = vshrl.u32 %v659_v50, 30 }
 0x1ed   :  { %v2263_v52 = vshrl.u32 %v554_v49, 30  ;;  %v452_v56 = vxor.u32 %v1538_v53, %v449_v51  ;;  %v714_v51 = vld [vmem:[%s2588_s8 + $0x10] sm:$0xff] }
 0x1ee   :  { %v661_v55 = vshll.u32 %v2265_v36, 30 }
 0x1ef   :  { %v556_v54 = vshll.u32 %v2263_v52, 30  ;;  %v453_v59 = vmul.u32 2246822507, %v452_v56  ;;  %v579_v34 = vsub.s32 4, %v2263_v52 }
 0x1f0   :  { %v662_v58 = vsub.s32 %v658_v21, %v661_v55 }
 0x1f1   :  { %v557_v57 = vsub.s32 %v553_v47, %v556_v54  ;;  %v1539_v0 = vshrl.u32 %v453_v59, 13 }
 0x1f2   :  { %v664_v61 = vsub.s32 0, %v662_v58 }
 0x1f3   :  { %v559_v60 = vsub.s32 0, %v557_v57  ;;  %v456_v2 = vxor.u32 %v1539_v0, %v453_v59  ;;  %v580_v59 = vsel %vm495_vm0, %v579_v34, %v2263_v52  ;;  %v721_v34 = vld [vmem:[%s2588_s8 + $0x48] sm:$0xff] }
 0x1f4   :  { %v1550_v1 = vmin.u32 %v664_v61, %v662_v58 }
 0x1f5   :  { %v1545_v44 = vmin.u32 %v559_v60, %v557_v57  ;;  %v457_v5 = vmul.u32 3266489909, %v456_v2 }
 0x1f6   :  { %v666_v4 = vclz %v1550_v1 }
 0x1f7   :  { %v561_v3 = vclz %v1545_v44  ;;  %v1540_v8 = vshrl.u32 %v457_v5, 16  ;;  %v582_v44 = vsel %vm2275_vm2, 0, %v580_v59  ;;  %v723_v59 = vld [vmem:[%s2588_s8 + $0x58] sm:$0xff] }
 0x1f8   :  { %v1551_v7 = vadd.s32 4294967294, %v666_v4 }
 0x1f9   :  { %v1546_v6 = vadd.s32 4294967294, %v561_v3  ;;  %v460_v10 = vxor.u32 %v1540_v8, %v457_v5 }
 0x1fa   :  { %vm1552_vm15 = vcmp.lt.s32.totalorder %v1551_v7, 0 }
 0x1fb   :  { %vm1547_vm14 = vcmp.lt.s32.totalorder %v1546_v6, 0  ;;  %v669_v11 = vsel %vm1552_vm15, 0, %v1551_v7  ;;  %v461_v17 = vand.u32 8388607, %v460_v10  ;;  %v335_v7 = vpop.permute.xlu1 %334  ;;  %vm831_vm15 = vcmask 130048  }
 0x1fc   :  { %v564_v9 = vsel %vm1547_vm14, 0, %v1546_v6  ;;  %v674_v16 = vsub.s32 4294967266, %v669_v11  ;;  %v670_v25 = vsub.s32 32, %v669_v11  ;;  %v671_v22 = vshll.u32 %v662_v58, %v669_v11 }
 0x1fd   :  { %v569_v15 = vsub.s32 4294967266, %v564_v9  ;;  %v565_v19 = vsub.s32 32, %v564_v9  ;;  %v462_v29 = vcvt.s32.f32 %v461_v17  ;;  %v566_v30 = vshll.u32 %v557_v57, %v564_v9  ;;  %v330_v9 = vpop.permute.xlu0 %329 }
 0x1fe   :  { %v675_v26 = vadd.s32 127, %v674_v16  ;;  %v672_v33 = vshrl.u32 %v654_v24, %v670_v25  ;;  %v684_v57 = vsub.s32 4, %v2265_v36  ;;  %v586_v6 = vand.u32 3, %v582_v44  ;;  %v727_v44 = vld [vmem:[%s2588_s8 + $0x78] sm:$0xff] }
 0x1ff   :  { %v570_v20 = vadd.s32 127, %v569_v15  ;;  %v567_v31 = vshrl.u32 %v549_v18, %v565_v19  ;;  %v463_v37 = vadd.f32 0.5, %v462_v29  ;;  %vm585_vm14 = vweird.f32 %v2147_v62 }
 0x200   :  { %v676_v35 = vshll.u32 %v675_v26, 23  ;;  %v673_v41 = vor.u32 %v672_v33, %v671_v22  ;;  %v685_v58 = vsel %vm600_vm1, %v684_v57, %v2265_v36  ;;  %vm588_vm6 = vcmp.eq.s32.totalorder %v586_v6, 0  ;;  %v720_v57 = vld [vmem:[%s2588_s8 + $0x40] sm:$0xff] }
 0x201   :  { %v571_v14 = vshll.u32 %v570_v20, 23  ;;  %v568_v38 = vor.u32 %v567_v31, %v566_v30  ;;  %v464_v43 = vmul.f32 1.1920929e-07, %v463_v37  ;;  %v687_v60 = vsel %vm2283_vm3, 0, %v685_v58  ;;  %v722_v58 = vld [vmem:[%s2588_s8 + $0x50] sm:$0xff] }
 0x202   :  { %v677_v42 = vor.u32 4788187, %v676_v35  ;;  %v680_v46 = vcvt.s32.f32 %v673_v41  ;;  %v691_v3 = vand.u32 3, %v687_v60  ;;  %vm591_vm7 = vcmp.eq.s32.totalorder %v586_v6, 2  ;;  %v724_v60 = vld [vmem:[%s2588_s8 + $0x60] sm:$0xff] }
 0x203   :  { %v572_v40 = vor.u32 4788187, %v571_v14  ;;  %v575_v27 = vcvt.s32.f32 %v568_v38  ;;  %1833 = vlog2.f32 %v464_v43  ;;  %vm587_vm10 = vcmp.lt.s32.totalorder %v586_v6, 2 }
 0x204   :  { %v678_v45 = vand.u32 2147483647, %v677_v42  ;;  %vm693_vm4 = vcmp.eq.s32.totalorder %v691_v3, 0  ;;  %vm696_vm5 = vcmp.eq.s32.totalorder %v691_v3, 2  ;;  %vm692_vm9 = vcmp.lt.s32.totalorder %v691_v3, 2 }
 0x205   :  { %v573_v23 = vand.u32 2147483647, %v572_v40 }
 0x206   :  { %v681_v12 = vmul.f32 %v680_v46, %v678_v45  ;;  %v320_v46 = vpop.permute.xlu0 %319 }
 0x207   :  { %v576_v28 = vmul.f32 %v575_v27, %v573_v23  ;;  %v325_v27 = vpop.permute.xlu1 %324 }
 0x208   :  { %v682_v21 = vxor.u32 2147483648, %v681_v12 }
 0x209   :  { %v577_v47 = vxor.u32 2147483648, %v576_v28 }
 0x20a   :  { %v683_v53 = vsel %vm600_vm1, %v682_v21, %v681_v12 }
 0x20b   :  { %v578_v50 = vsel %vm495_vm0, %v577_v47, %v576_v28  ;;  %v686_v55 = vsel %vm2283_vm3, %v2150_v63, %v683_v53  ;;  %v715_v53 = vld [vmem:[%s2588_s8 + $0x18] sm:$0xff]  ;;  %vm1186_vm0 = vcmask 64512  }
 0x20c   :  { %v581_v13 = vsel %vm2275_vm2, %v2147_v62, %v578_v50  ;;  %v712_v62 = vld [vmem:[%s2588_s8] sm:$0xff]  ;;  %v713_v50 = vld [vmem:[%s2588_s8 + $0x8] sm:$0xff] }
 0x20d   :  { %v1834_v48 = vpop.eup %1833  ;;  %1835 = vcosq.f32 %v581_v13 }
 0x20e   :  { %v483_v54 = vmul.f32 0.6931472, %v1834_v48  ;;  %1837 = vcosq.f32 %v686_v55 }
 0x20f   :  { %1839 = vsinq.f32 %v686_v55  ;;  %v718_v55 = vld [vmem:[%s2588_s8 + $0x30] sm:$0xff] }
 0x210   :  { %v484_v56 = vmul.f32 -2.0, %v483_v54  ;;  %1841 = vsinq.f32 %v581_v13  ;;  %v716_v54 = vld [vmem:[%s2588_s8 + $0x20] sm:$0xff]  ;;  %v717_v13 = vld [vmem:[%s2588_s8 + $0x28] sm:$0xff] }
 0x212   :  { %1843 = vrsqrt.f32 %v484_v56  ;;  %vm487_vm8 = vcmp.eq.f32.partialorder %v484_v56, inf  ;;  %vm489_vm12 = vcmp.eq.f32.partialorder %v484_v56, 0.0  ;;  %v490_v22 = vand.u32 2147483648, %v484_v56 }
 0x217   :  { %v1836_v61 = vpop.eup %1835 }
 0x218   :  { %v1838_v1 = vpop.eup %1837  ;;  %v592_v18 = vxor.u32 2147483648, %v1836_v61 }
 0x219   :  { %v1840_v4 = vpop.eup %1839  ;;  %v697_v15 = vxor.u32 2147483648, %v1838_v1 }
 0x21a   :  { %v1842_v5 = vpop.eup %1841  ;;  %v694_v11 = vxor.u32 2147483648, %v1840_v4 }
 0x21b   :  { %v589_v17 = vxor.u32 2147483648, %v1842_v5  ;;  %v698_v29 = vsel %vm696_vm5, %v697_v15, %v1840_v4  ;;  %v593_v14 = vsel %vm591_vm7, %v592_v18, %v1842_v5  ;;  %v749_v5 = vpop.permute.xlu0 %748 }
 0x21c   :  { %v1844_v8 = vpop.eup %1843  ;;  %v695_v26 = vsel %vm693_vm4, %v1838_v1, %v694_v11  ;;  %v728_v1 = vld [vmem:[%s2588_s8 + $0x80] sm:$0xff] }
 0x21d   :  { %v486_v24 = vmul.f32 %v1844_v8, %v484_v56  ;;  %v590_v31 = vsel %vm588_vm6, %v1836_v61, %v589_v17  ;;  %v699_v35 = vsel %vm692_vm9, %v695_v26, %v698_v29  ;;  %v725_v61 = vld [vmem:[%s2588_s8 + $0x68] sm:$0xff] }
 0x21e   :  { %v594_v37 = vsel %vm587_vm10, %v590_v31, %v593_v14  ;;  %v700_v40 = vsel %vm690_vm13, nan, %v699_v35 }
 0x21f   :  { %v488_v33 = vsel %vm487_vm8, %v484_v56, %v486_v24  ;;  %v595_v41 = vsel %vm585_vm14, nan, %v594_v37  ;;  %v719_v56 = vld [vmem:[%s2588_s8 + $0x38] sm:$0xff]  ;;  %v759_v17 = vpop.permute.xlu0 %758 }
 0x220   :  { %v491_v38 = vsel %vm489_vm12, %v490_v22, %v488_v33 }
 0x221   :  { %v701_v42 = vmul.f32 %v700_v40, %v491_v38  ;;  %v596_v43 = vmul.f32 %v595_v41, %v491_v38 }
 0x223   :  { %v769_v22 = vpop.permute.xlu0 %768 }
 0x2af   :  { %v1671_v0 = vpop.f32.mrb[0].mxu0 }
 0x2b0   :  { %v415_v2 = vpop.f32.mrb[1].mxu0  ;;  %v421_v28 = vadd.f32 %v1671_v0, %v325_v27  ;;  %v726_v0 = vld [vmem:[%s2588_s8 + $0x70] sm:$0xff] }
 0x2b1   :  { %v416_v47 = vadd.f32 %v415_v2, %v320_v46  ;;  %v1051_v2 = vld [vmem:[%s2589_s10 + $0x8] sm:$0xff] }
 0x2b2   :  { %1570 = vmatprep.mubr.msk.f32.mxu0 %vm1186_vm0, %v1051_v2 }
 0x2b3   :  { %v1674_v36 = vpop.f32.mrb[2].mxu0 }
 0x2b4   :  { %v431_v10 = vadd.f32 %v1674_v36, %v335_v7  ;;  %v425_v52 = vpop.f32.mrb[3].mxu0  ;;  %v754_v7 = vpop.permute.xlu1 %753 }
 0x2b5   :  { %v426_v16 = vadd.f32 %v425_v52, %v330_v9 }
 0x2b6   :  { %v703_v19 = vmul.f32 0.5, %v431_v10 }
 0x2b7   :  { %v702_v20 = vmul.f32 0.5, %v426_v16 }
 0x2b8   :  { %v706_v25 = vmul.f32 1.442695, %v703_v19  ;;  %v764_v19 = vpop.permute.xlu1 %763 }
 0x2b9   :  { %v704_v30 = vmul.f32 1.442695, %v702_v20 }
 0x2ba   :  { %1845 = vpow2.f32 %v706_v25 }
 0x2bb   :  { %1847 = vpow2.f32 %v704_v30 }
 0x2bc   :  { %v774_v35 = vpop.permute.xlu1 %773 }
 0x2c4   :  { %v1846_v23 = vpop.eup %1845 }
 0x2c5   :  { %v1848_v45 = vpop.eup %1847  ;;  %v709_v12 = vmul.f32 %v1846_v23, %v701_v42 }
 0x2c6   :  { %v708_v21 = vmul.f32 %v1848_v45, %v596_v43  ;;  %v779_v45 = vpop.permute.xlu0 %778 }
 0x2c7   :  { %v711_v48 = vadd.f32 %v709_v12, %v421_v28  ;;  %v784_v28 = vpop.permute.xlu1 %783 }
 0x2c8   :  { %v710_v49 = vadd.f32 %v708_v21, %v416_v47 }
 0x2ca   :  { %v1755_v63 = vpack.c.bf16 %v711_v48, %v710_v49 }
 0x2cc   :  { %1756 = vmatpush3.bf16.msra.mxu1 %v1755_v63 }
 0x2cd   :  { %1781 = vmatprep.subr.bf16.mxu1 %v1856_v39 }
 0x2cf   :  { %1680 = vmatmul.mubr.msk.f32.vlgmr.msra.gmra.mrb[8].mxu1 %vm831_vm15, %v712_v62 }
 0x2d0   :  { %1682 = vmatprep.mubr.msk.f32.mxu1 %vm1857_vm11, %v1858_v32 }
 0x2d3   :  { %1683 = vmatmul.mubr.msk.f32.gmra.mrb[10].mxu1 %vm831_vm15, %v713_v50 }
 0x2d4   :  { %1685 = vmatprep.mubr.msk.f32.mxu1 %vm1857_vm11, %v1858_v32 }
 0x2d7   :  { %1686 = vmatmul.mubr.msk.f32.gmra.mrb[12].mxu1 %vm831_vm15, %v714_v51  ;;  %v789_v51 = vpop.permute.xlu0 %788 }
 0x2d8   :  { %1688 = vmatprep.mubr.msk.f32.mxu1 %vm1857_vm11, %v1858_v32 }
 0x2db   :  { %1689 = vmatmul.mubr.msk.f32.gmra.mrb[14].mxu1 %vm831_vm15, %v715_v53 }
 0x2dc   :  { %1691 = vmatprep.mubr.msk.f32.mxu1 %vm1857_vm11, %v1858_v32 }
 0x2df   :  { %1692 = vmatmul.mubr.msk.f32.gmra.mrb[16].mxu1 %vm831_vm15, %v716_v54  ;;  %v794_v54 = vpop.permute.xlu1 %793 }
 0x2e0   :  { %1694 = vmatprep.mubr.msk.f32.mxu1 %vm1857_vm11, %v1858_v32 }
 0x2e3   :  { %1695 = vmatmul.mubr.msk.f32.gmra.mrb[18].mxu1 %vm831_vm15, %v717_v13 }
 0x2e4   :  { %1697 = vmatprep.mubr.msk.f32.mxu1 %vm1857_vm11, %v1858_v32 }
 0x2e7   :  { %1698 = vmatmul.mubr.msk.f32.gmra.mrb[20].mxu1 %vm831_vm15, %v718_v55 }
 0x2e8   :  { %1700 = vmatprep.mubr.msk.f32.mxu1 %vm1857_vm11, %v1858_v32 }
 0x2eb   :  { %1701 = vmatmul.mubr.msk.f32.gmra.mrb[22].mxu1 %vm831_vm15, %v719_v56 }
 0x2ec   :  { %1703 = vmatprep.mubr.msk.f32.mxu1 %vm1857_vm11, %v1858_v32 }
 0x2ef   :  { %1704 = vmatmul.mubr.msk.f32.gmra.mrb[24].mxu1 %vm831_vm15, %v720_v57 }
 0x2f0   :  { %1706 = vmatprep.mubr.msk.f32.mxu1 %vm1857_vm11, %v1858_v32 }
 0x2f3   :  { %1707 = vmatmul.mubr.msk.f32.gmra.mrb[26].mxu1 %vm831_vm15, %v721_v34 }
 0x2f4   :  { %1709 = vmatprep.mubr.msk.f32.mxu1 %vm1857_vm11, %v1858_v32 }
 0x2f7   :  { %1710 = vmatmul.mubr.msk.f32.gmra.mrb[28].mxu1 %vm831_vm15, %v722_v58 }
 0x2f8   :  { %1712 = vmatprep.mubr.msk.f32.mxu1 %vm1857_vm11, %v1858_v32 }
 0x2fb   :  { %1713 = vmatmul.mubr.msk.f32.gmra.mrb[30].mxu1 %vm831_vm15, %v723_v59 }
 0x2fc   :  { %1715 = vmatprep.mubr.msk.f32.mxu1 %vm1857_vm11, %v1858_v32 }
 0x2ff   :  { %1716 = vmatmul.mubr.msk.f32.gmra.mrb[32].mxu1 %vm831_vm15, %v724_v60 }
 0x300   :  { %1718 = vmatprep.mubr.msk.f32.mxu1 %vm1857_vm11, %v1858_v32 }
 0x303   :  { %1719 = vmatmul.mubr.msk.f32.gmra.mrb[34].mxu1 %vm831_vm15, %v725_v61  ;;  %v799_v61 = vpop.permute.xlu0 %798 }
 0x304   :  { %1721 = vmatprep.mubr.msk.f32.mxu1 %vm1857_vm11, %v1858_v32 }
 0x307   :  { %1722 = vmatmul.mubr.msk.f32.gmra.mrb[36].mxu1 %vm831_vm15, %v726_v0 }
 0x308   :  { %1724 = vmatprep.mubr.msk.f32.mxu1 %vm1857_vm11, %v1858_v32 }
 0x30b   :  { %1725 = vmatmul.mubr.msk.f32.gmra.mrb[38].mxu1 %vm831_vm15, %v727_v44  ;;  %v804_v44 = vpop.permute.xlu1 %803 }
 0x30c   :  { %1727 = vmatprep.mubr.msk.f32.mxu1 %vm1857_vm11, %v1858_v32  ;;  %vm1520_vm11 = vcmask 57344  }
 0x30f   :  { %1728 = vmatmul.mubr.msk.f32.gmra.mrb[40].mxu1 %vm831_vm15, %v728_v1 }
 0x3a2   :  { %v949_v3 = vpop.f32.mrb[8].mxu1 }
 0x3a3   :  { %v1681_v4 = vpop.f32.mrb[9].mxu1  ;;  %v950_v6 = vadd.f32 %v949_v3, %v749_v5 }
 0x3a5   :  { %v1033_v10 = vmax.f32 %v950_v6, 0.0 }
 0x3a6   :  { %v954_v36 = vpop.f32.mrb[10].mxu1 }
 0x3a7   :  { %v955_v8 = vadd.f32 %v954_v36, %v754_v7  ;;  %v1684_v9 = vpop.f32.mrb[11].mxu1 }
 0x3a9   :  { %v1034_v52 = vmax.f32 %v955_v8, 0.0  ;;  %v809_v8 = vpop.permute.xlu0 %808 }
 0x3aa   :  { %v959_v11 = vpop.f32.mrb[12].mxu1 }
 0x3ab   :  { %v1758_v15 = vpack.c.bf16 %v1034_v52, %v1033_v10  ;;  %v1687_v16 = vpop.f32.mrb[13].mxu1  ;;  %v960_v18 = vadd.f32 %v959_v11, %v759_v17  ;;  %v814_v10 = vpop.permute.xlu1 %813 }
 0x3ad   :  { %1759 = vmatpush1.bf16.msra.mxu0 %v1758_v15  ;;  %v1035_v26 = vmax.f32 %v960_v18, 0.0 }
 0x3ae   :  { %v964_v20 = vpop.f32.mrb[14].mxu1  ;;  %1760 = vmatprep.subr.bf16.mxu0 %v1856_v39 }
 0x3af   :  { %v965_v24 = vadd.f32 %v964_v20, %v764_v19  ;;  %v1690_v25 = vpop.f32.mrb[15].mxu1 }
 0x3b1   :  { %v1036_v29 = vmax.f32 %v965_v24, 0.0  ;;  %v819_v24 = vpop.permute.xlu0 %818 }
 0x3b2   :  { %v969_v30 = vpop.f32.mrb[16].mxu1 }
 0x3b3   :  { %v1761_v31 = vpack.c.bf16 %v1036_v29, %v1035_v26  ;;  %v1693_v14 = vpop.f32.mrb[17].mxu1  ;;  %v970_v33 = vadd.f32 %v969_v30, %v769_v22  ;;  %v824_v26 = vpop.permute.xlu1 %823 }
 0x3b5   :  { %1762 = vmatpush1.bf16.msra.mxu0 %v1761_v31  ;;  %v1037_v41 = vmax.f32 %v970_v33, 0.0  ;;  %v829_v33 = vpop.permute.xlu0 %828 }
 0x3b6   :  { %v974_v37 = vpop.f32.mrb[18].mxu1  ;;  %1763 = vmatprep.subr.bf16.mxu0 %v1856_v39 }
 0x3b7   :  { %v975_v38 = vadd.f32 %v974_v37, %v774_v35  ;;  %v1696_v40 = vpop.f32.mrb[19].mxu1 }
 0x3b9   :  { %v1038_v42 = vmax.f32 %v975_v38, 0.0 }
 0x3ba   :  { %v979_v43 = vpop.f32.mrb[20].mxu1 }
 0x3bb   :  { %v1764_v23 = vpack.c.bf16 %v1038_v42, %v1037_v41  ;;  %v1699_v27 = vpop.f32.mrb[21].mxu1  ;;  %v980_v46 = vadd.f32 %v979_v43, %v779_v45  ;;  %v1050_v42 = vld [vmem:[%s2589_s10] sm:$0xff]  ;;  %v1053_v43 = vld [vmem:[%s2589_s10 + $0x18] sm:$0xff] }
 0x3bc   :  { %v1055_v27 = vld [vmem:[%s2589_s10 + $0x28] sm:$0xff]  ;;  %v1054_v45 = vld [vmem:[%s2589_s10 + $0x20] sm:$0xff] }
 0x3bd   :  { %1765 = vmatpush1.bf16.msra.mxu0 %v1764_v23  ;;  %v1039_v48 = vmax.f32 %v980_v46, 0.0  ;;  %v1052_v23 = vld [vmem:[%s2589_s10 + $0x10] sm:$0xff]  ;;  %v1057_v46 = vld [vmem:[%s2589_s10 + $0x38] sm:$0xff] }
 0x3be   :  { %v984_v12 = vpop.f32.mrb[22].mxu1  ;;  %1766 = vmatprep.subr.bf16.mxu0 %v1856_v39 }
 0x3bf   :  { %v985_v47 = vadd.f32 %v984_v12, %v784_v28  ;;  %v1702_v21 = vpop.f32.mrb[23].mxu1  ;;  %v1056_v28 = vld [vmem:[%s2589_s10 + $0x30] sm:$0xff]  ;;  %v1059_v12 = vld [vmem:[%s2589_s10 + $0x48] sm:$0xff] }
 0x3c0   :  { %v1061_v21 = vld [vmem:[%s2589_s10 + $0x58] sm:$0xff] }
 0x3c1   :  { %v1040_v49 = vmax.f32 %v985_v47, 0.0  ;;  %v1058_v47 = vld [vmem:[%s2589_s10 + $0x40] sm:$0xff] }
 0x3c2   :  { %v989_v63 = vpop.f32.mrb[24].mxu1 }
 0x3c3   :  { %v1767_v62 = vpack.c.bf16 %v1040_v49, %v1039_v48  ;;  %v1705_v50 = vpop.f32.mrb[25].mxu1  ;;  %v990_v53 = vadd.f32 %v989_v63, %v789_v51  ;;  %v1060_v48 = vld [vmem:[%s2589_s10 + $0x50] sm:$0xff]  ;;  %v1063_v49 = vld [vmem:[%s2589_s10 + $0x68] sm:$0xff]  ;;  %v1062_v63 = vld [vmem:[%s2589_s10 + $0x60] sm:$0xff] }
 0x3c4   :  { %v1064_v50 = vld [vmem:[%s2589_s10 + $0x70] sm:$0xff]  ;;  %v1067_v51 = vld [vmem:[%s2589_s10 + $0x88] sm:$0xff] }
 0x3c5   :  { %1768 = vmatpush1.bf16.msra.mxu0 %v1767_v62  ;;  %v1041_v57 = vmax.f32 %v990_v53, 0.0  ;;  %v1065_v62 = vld [vmem:[%s2589_s10 + $0x78] sm:$0xff]  ;;  %v1066_v53 = vld [vmem:[%s2589_s10 + $0x80] sm:$0xff] }
 0x3c6   :  { %v994_v13 = vpop.f32.mrb[26].mxu1  ;;  %1769 = vmatprep.subr.bf16.mxu0 %v1856_v39 }
 0x3c7   :  { %v995_v55 = vadd.f32 %v994_v13, %v794_v54  ;;  %v1708_v56 = vpop.f32.mrb[27].mxu1  ;;  %v1069_v54 = vld [vmem:[%s2589_s10 + $0x98] sm:$0xff]  ;;  %v1068_v13 = vld [vmem:[%s2589_s10 + $0x90] sm:$0xff] }
 0x3c8   :  { %v1070_v56 = vld [vmem:[%s2589_s10 + $0xa0] sm:$0xff] }
 0x3c9   :  { %v1042_v34 = vmax.f32 %v995_v55, 0.0  ;;  %v1071_v55 = vld [vmem:[%s2589_s10 + $0xa8] sm:$0xff] }
 0x3ca   :  { %v999_v58 = vpop.f32.mrb[28].mxu1 }
 0x3cb   :  { %v1770_v59 = vpack.c.bf16 %v1042_v34, %v1041_v57  ;;  %v1711_v60 = vpop.f32.mrb[29].mxu1  ;;  %v1000_v0 = vadd.f32 %v999_v58, %v799_v61  ;;  %v1073_v57 = vld [vmem:[%s2589_s10 + $0xb8] sm:$0xff]  ;;  %v1072_v34 = vld [vmem:[%s2589_s10 + $0xb0] sm:$0xff]  ;;  %v1075_v58 = vld [vmem:[%s2589_s10 + $0xc8] sm:$0xff] }
 0x3cc   :  { %v1077_v60 = vld [vmem:[%s2589_s10 + $0xd8] sm:$0xff]  ;;  %v1076_v61 = vld [vmem:[%s2589_s10 + $0xd0] sm:$0xff] }
 0x3cd   :  { %1771 = vmatpush1.bf16.msra.mxu0 %v1770_v59  ;;  %v1043_v4 = vmax.f32 %v1000_v0, 0.0  ;;  %v1074_v59 = vld [vmem:[%s2589_s10 + $0xc0] sm:$0xff]  ;;  %v1079_v0 = vld [vmem:[%s2589_s10 + $0xe8] sm:$0xff] }
 0x3ce   :  { %v1004_v1 = vpop.f32.mrb[30].mxu1  ;;  %1772 = vmatprep.subr.bf16.mxu0 %v1856_v39 }
 0x3cf   :  { %v1005_v2 = vadd.f32 %v1004_v1, %v804_v44  ;;  %v1714_v3 = vpop.f32.mrb[31].mxu1  ;;  %v1078_v44 = vld [vmem:[%s2589_s10 + $0xe0] sm:$0xff]  ;;  %v1081_v1 = vld [vmem:[%s2589_s10 + $0xf8] sm:$0xff] }
 0x3d0   :  { %v1083_v3 = vld [vmem:[%s2589_s10 + $0x108] sm:$0xff] }
 0x3d1   :  { %v1044_v5 = vmax.f32 %v1005_v2, 0.0  ;;  %v1080_v2 = vld [vmem:[%s2589_s10 + $0xf0] sm:$0xff] }
 0x3d2   :  { %v1009_v6 = vpop.f32.mrb[32].mxu1 }
 0x3d3   :  { %v1773_v7 = vpack.c.bf16 %v1044_v5, %v1043_v4  ;;  %v1717_v36 = vpop.f32.mrb[33].mxu1  ;;  %v1010_v9 = vadd.f32 %v1009_v6, %v809_v8  ;;  %v1082_v4 = vld [vmem:[%s2589_s10 + $0x100] sm:$0xff]  ;;  %v1406_v5 = vld [vmem:[%s2590_s12 + $0x8] sm:$0xff] }
 0x3d4   :  { %1587 = vmatprep.mubr.msk.f32.mxu1 %vm1186_vm0, %v1406_v5  ;;  %v1104_v36 = vpop.permute.xlu1 %1103 }
 0x3d5   :  { %1774 = vmatpush1.bf16.msra.mxu0 %v1773_v7  ;;  %v1045_v16 = vmax.f32 %v1010_v9, 0.0  ;;  %v1109_v9 = vpop.permute.xlu0 %1108 }
 0x3d6   :  { %v1014_v52 = vpop.f32.mrb[34].mxu1  ;;  %1775 = vmatprep.subr.bf16.mxu0 %v1856_v39 }
 0x3d7   :  { %v1015_v11 = vadd.f32 %v1014_v52, %v814_v10  ;;  %v1720_v15 = vpop.f32.mrb[35].mxu1 }
 0x3d9   :  { %v1046_v17 = vmax.f32 %v1015_v11, 0.0 }
 0x3da   :  { %v1019_v18 = vpop.f32.mrb[36].mxu1 }
 0x3db   :  { %v1776_v19 = vpack.c.bf16 %v1046_v17, %v1045_v16  ;;  %v1723_v20 = vpop.f32.mrb[37].mxu1  ;;  %v1020_v25 = vadd.f32 %v1019_v18, %v819_v24 }
 0x3dc   :  { %v1114_v20 = vpop.permute.xlu1 %1113 }
 0x3dd   :  { %1777 = vmatpush1.bf16.msra.mxu0 %v1776_v19  ;;  %v1047_v14 = vmax.f32 %v1020_v25, 0.0  ;;  %v1119_v25 = vpop.permute.xlu0 %1118 }
 0x3de   :  { %v1024_v29 = vpop.f32.mrb[38].mxu1  ;;  %1778 = vmatprep.subr.bf16.mxu0 %v1856_v39 }
 0x3df   :  { %v1025_v30 = vadd.f32 %v1024_v29, %v824_v26  ;;  %v1726_v31 = vpop.f32.mrb[39].mxu1 }
 0x3e1   :  { %v1048_v22 = vmax.f32 %v1025_v30, 0.0 }
 0x3e2   :  { %v1029_v35 = vpop.f32.mrb[40].mxu1 }
 0x3e3   :  { %v1779_v37 = vpack.c.bf16 %v1048_v22, %v1047_v14  ;;  %v1030_v38 = vadd.f32 %v1029_v35, %v829_v33  ;;  %v1729_v40 = vpop.f32.mrb[41].mxu1 }
 0x3e4   :  { %v1129_v40 = vpop.permute.xlu0 %1128 }
 0x3e5   :  { %1780 = vmatpush1.bf16.msra.mxu0 %v1779_v37  ;;  %v1049_v41 = vmax.f32 %v1030_v38, 0.0  ;;  %v1124_v37 = vpop.permute.xlu1 %1123 }
 0x3e6   :  { %1270 = vmatprep.subr.mxu0 %v1858_v32 }
 0x3e9   :  { %1271 = vmatpush1.msra.mxu0 %v1049_v41 }
 0x3ea   :  { %1303 = vmatmul.mubr.f32.vlgmr.msra.gmra.mrb[4].mxu0 %v1050_v42 }
 0x3eb   :  { %1571 = vmatprep.mubr.msk.f32.mxu0 %vm1186_vm0, %v1053_v43 }
 0x3ee   :  { %1308 = vmatmul.mubr.f32.gmra.mrb[6].mxu0 %v1052_v23 }
 0x3ef   :  { %1572 = vmatprep.mubr.msk.f32.mxu0 %vm1186_vm0, %v1055_v27 }
 0x3f2   :  { %1313 = vmatmul.mubr.f32.gmra.mrb[8].mxu0 %v1054_v45 }
 0x3f3   :  { %1573 = vmatprep.mubr.msk.f32.mxu0 %vm1186_vm0, %v1057_v46 }
 0x3f6   :  { %1318 = vmatmul.mubr.f32.gmra.mrb[10].mxu0 %v1056_v28 }
 0x3f7   :  { %1574 = vmatprep.mubr.msk.f32.mxu0 %vm1186_vm0, %v1059_v12  ;;  %v1134_v12 = vpop.permute.xlu1 %1133 }
 0x3fa   :  { %1323 = vmatmul.mubr.f32.gmra.mrb[12].mxu0 %v1058_v47 }
 0x3fb   :  { %1575 = vmatprep.mubr.msk.f32.mxu0 %vm1186_vm0, %v1061_v21  ;;  %v1139_v21 = vpop.permute.xlu0 %1138 }
 0x3fe   :  { %1328 = vmatmul.mubr.f32.gmra.mrb[14].mxu0 %v1060_v48 }
 0x3ff   :  { %1576 = vmatprep.mubr.msk.f32.mxu0 %vm1186_vm0, %v1063_v49 }
 0x402   :  { %1333 = vmatmul.mubr.f32.gmra.mrb[16].mxu0 %v1062_v63 }
 0x403   :  { %1577 = vmatprep.mubr.msk.f32.mxu0 %vm1186_vm0, %v1065_v62 }
 0x406   :  { %1338 = vmatmul.mubr.f32.gmra.mrb[18].mxu0 %v1064_v50 }
 0x407   :  { %1578 = vmatprep.mubr.msk.f32.mxu0 %vm1186_vm0, %v1067_v51 }
 0x40a   :  { %1343 = vmatmul.mubr.f32.gmra.mrb[20].mxu0 %v1066_v53 }
 0x40b   :  { %1579 = vmatprep.mubr.msk.f32.mxu0 %vm1186_vm0, %v1069_v54 }
 0x40e   :  { %1348 = vmatmul.mubr.f32.gmra.mrb[22].mxu0 %v1068_v13  ;;  %v1144_v13 = vpop.permute.xlu1 %1143 }
 0x40f   :  { %1580 = vmatprep.mubr.msk.f32.mxu0 %vm1186_vm0, %v1071_v55 }
 0x412   :  { %1353 = vmatmul.mubr.f32.gmra.mrb[24].mxu0 %v1070_v56  ;;  %v1149_v56 = vpop.permute.xlu0 %1148 }
 0x413   :  { %1581 = vmatprep.mubr.msk.f32.mxu0 %vm1186_vm0, %v1073_v57 }
 0x416   :  { %1358 = vmatmul.mubr.f32.gmra.mrb[26].mxu0 %v1072_v34 }
 0x417   :  { %1582 = vmatprep.mubr.msk.f32.mxu0 %vm1186_vm0, %v1075_v58 }
 0x41a   :  { %1363 = vmatmul.mubr.f32.gmra.mrb[28].mxu0 %v1074_v59 }
 0x41b   :  { %1583 = vmatprep.mubr.msk.f32.mxu0 %vm1186_vm0, %v1077_v60 }
 0x41e   :  { %1368 = vmatmul.mubr.f32.gmra.mrb[30].mxu0 %v1076_v61 }
 0x41f   :  { %1584 = vmatprep.mubr.msk.f32.mxu0 %vm1186_vm0, %v1079_v0 }
 0x422   :  { %1373 = vmatmul.mubr.f32.gmra.mrb[32].mxu0 %v1078_v44 }
 0x423   :  { %1585 = vmatprep.mubr.msk.f32.mxu0 %vm1186_vm0, %v1081_v1  ;;  %v1154_v1 = vpop.permute.xlu1 %1153 }
 0x426   :  { %1378 = vmatmul.mubr.f32.gmra.mrb[34].mxu0 %v1080_v2 }
 0x427   :  { %1586 = vmatprep.mubr.msk.f32.mxu0 %vm1186_vm0, %v1083_v3  ;;  %v1159_v3 = vpop.permute.xlu0 %1158 }
 0x42a   :  { %1383 = vmatmul.mubr.f32.gmra.mrb[36].mxu0 %v1082_v4 }
 0x4bd   :  { %v1304_v6 = vpop.f32.mrb[4].mxu0 }
 0x4be   :  { %v1306_v7 = vpop.f32.mrb[5].mxu0  ;;  %v1305_v8 = vadd.f32 %v1304_v6, %v1104_v36 }
 0x4c0   :  { %v1388_v15 = vmax.f32 %v1305_v8, 0.0 }
 0x4c1   :  { %v1309_v10 = vpop.f32.mrb[6].mxu0 }
 0x4c2   :  { %v1310_v52 = vadd.f32 %v1309_v10, %v1109_v9  ;;  %v1311_v11 = vpop.f32.mrb[7].mxu0 }
 0x4c4   :  { %v1389_v16 = vmax.f32 %v1310_v52, 0.0  ;;  %v1164_v52 = vpop.permute.xlu1 %1163 }
 0x4c5   :  { %v1314_v17 = vpop.f32.mrb[8].mxu0 }
 0x4c6   :  { %v1782_v18 = vpack.c.bf16 %v1389_v16, %v1388_v15  ;;  %v1316_v19 = vpop.f32.mrb[9].mxu0  ;;  %v1315_v24 = vadd.f32 %v1314_v17, %v1114_v20  ;;  %v1169_v15 = vpop.permute.xlu0 %1168 }
 0x4c8   :  { %1783 = vmatpush1.bf16.msra.mxu1 %v1782_v18  ;;  %v1390_v31 = vmax.f32 %v1315_v24, 0.0 }
 0x4c9   :  { %v1319_v26 = vpop.f32.mrb[10].mxu0  ;;  %1784 = vmatprep.subr.bf16.mxu1 %v1856_v39 }
 0x4ca   :  { %v1320_v29 = vadd.f32 %v1319_v26, %v1119_v25  ;;  %v1321_v30 = vpop.f32.mrb[11].mxu0 }
 0x4cc   :  { %v1391_v14 = vmax.f32 %v1320_v29, 0.0  ;;  %v1174_v29 = vpop.permute.xlu1 %1173 }
 0x4cd   :  { %v1324_v22 = vpop.f32.mrb[12].mxu0 }
 0x4ce   :  { %v1785_v33 = vpack.c.bf16 %v1391_v14, %v1390_v31  ;;  %v1326_v35 = vpop.f32.mrb[13].mxu0  ;;  %v1325_v38 = vadd.f32 %v1324_v22, %v1124_v37  ;;  %v1179_v31 = vpop.permute.xlu0 %1178 }
 0x4d0   :  { %1786 = vmatpush1.bf16.msra.mxu1 %v1785_v33  ;;  %v1392_v23 = vmax.f32 %v1325_v38, 0.0  ;;  %v1184_v38 = vpop.permute.xlu1 %1183 }
 0x4d1   :  { %v1329_v41 = vpop.f32.mrb[14].mxu0  ;;  %1787 = vmatprep.subr.bf16.mxu1 %v1856_v39 }
 0x4d2   :  { %v1330_v42 = vadd.f32 %v1329_v41, %v1129_v40  ;;  %v1331_v43 = vpop.f32.mrb[15].mxu0 }
 0x4d4   :  { %v1393_v27 = vmax.f32 %v1330_v42, 0.0 }
 0x4d5   :  { %v1334_v45 = vpop.f32.mrb[16].mxu0 }
 0x4d6   :  { %v1788_v46 = vpack.c.bf16 %v1393_v27, %v1392_v23  ;;  %v1336_v28 = vpop.f32.mrb[17].mxu0  ;;  %v1335_v47 = vadd.f32 %v1334_v45, %v1134_v12  ;;  %v1405_v27 = vld [vmem:[%s2590_s12] sm:$0xff]  ;;  %v1407_v45 = vld [vmem:[%s2590_s12 + $0x10] sm:$0xff] }
 0x4d7   :  { %v1417_v28 = vpop.permute.xlu0 %1416 }
 0x4d8   :  { %1789 = vmatpush1.bf16.msra.mxu1 %v1788_v46  ;;  %v1394_v62 = vmax.f32 %v1335_v47, 0.0  ;;  %v1409_v46 = vld [vmem:[%s2590_s12 + $0x20] sm:$0x1] }
 0x4d9   :  { %v1339_v48 = vpop.f32.mrb[18].mxu0  ;;  %1790 = vmatprep.subr.bf16.mxu1 %v1856_v39 }
 0x4da   :  { %v1340_v49 = vadd.f32 %v1339_v48, %v1139_v21  ;;  %v1341_v63 = vpop.f32.mrb[19].mxu0  ;;  %v1422_v48 = vpop.permute.xlu1 %1421 }
 0x4dc   :  { %v1395_v50 = vmax.f32 %v1340_v49, 0.0 }
 0x4dd   :  { %v1344_v51 = vpop.f32.mrb[20].mxu0 }
 0x4de   :  { %v1791_v53 = vpack.c.bf16 %v1395_v50, %v1394_v62  ;;  %v1346_v54 = vpop.f32.mrb[21].mxu0  ;;  %v1345_v55 = vadd.f32 %v1344_v51, %v1144_v13  ;;  %v1427_v50 = vpop.permute.xlu0 %1426 }
 0x4e0   :  { %1792 = vmatpush1.bf16.msra.mxu1 %v1791_v53  ;;  %v1396_v59 = vmax.f32 %v1345_v55, 0.0 }
 0x4e1   :  { %v1349_v57 = vpop.f32.mrb[22].mxu0  ;;  %1793 = vmatprep.subr.bf16.mxu1 %v1856_v39 }
 0x4e2   :  { %v1350_v34 = vadd.f32 %v1349_v57, %v1149_v56  ;;  %v1351_v58 = vpop.f32.mrb[23].mxu0 }
 0x4e4   :  { %v1397_v60 = vmax.f32 %v1350_v34, 0.0 }
 0x4e5   :  { %v1354_v61 = vpop.f32.mrb[24].mxu0 }
 0x4e6   :  { %v1794_v0 = vpack.c.bf16 %v1397_v60, %v1396_v59  ;;  %v1356_v44 = vpop.f32.mrb[25].mxu0  ;;  %v1355_v2 = vadd.f32 %v1354_v61, %v1154_v1 }
 0x4e8   :  { %1795 = vmatpush1.bf16.msra.mxu1 %v1794_v0  ;;  %v1398_v7 = vmax.f32 %v1355_v2, 0.0 }
 0x4e9   :  { %v1359_v4 = vpop.f32.mrb[26].mxu0  ;;  %1796 = vmatprep.subr.bf16.mxu1 %v1856_v39 }
 0x4ea   :  { %v1360_v5 = vadd.f32 %v1359_v4, %v1159_v3  ;;  %v1361_v6 = vpop.f32.mrb[27].mxu0 }
 0x4ec   :  { %v1399_v36 = vmax.f32 %v1360_v5, 0.0 }
 0x4ed   :  { %v1364_v8 = vpop.f32.mrb[28].mxu0 }
 0x4ee   :  { %v1797_v9 = vpack.c.bf16 %v1399_v36, %v1398_v7  ;;  %v1366_v10 = vpop.f32.mrb[29].mxu0  ;;  %v1365_v11 = vadd.f32 %v1364_v8, %v1164_v52 }
 0x4f0   :  { %1798 = vmatpush1.bf16.msra.mxu1 %v1797_v9  ;;  %v1400_v19 = vmax.f32 %v1365_v11, 0.0 }
 0x4f1   :  { %v1369_v16 = vpop.f32.mrb[30].mxu0  ;;  %1799 = vmatprep.subr.bf16.mxu1 %v1856_v39 }
 0x4f2   :  { %v1370_v17 = vadd.f32 %v1369_v16, %v1169_v15  ;;  %v1371_v18 = vpop.f32.mrb[31].mxu0 }
 0x4f4   :  { %v1401_v20 = vmax.f32 %v1370_v17, 0.0 }
 0x4f5   :  { %v1374_v24 = vpop.f32.mrb[32].mxu0 }
 0x4f6   :  { %v1800_v25 = vpack.c.bf16 %v1401_v20, %v1400_v19  ;;  %v1376_v26 = vpop.f32.mrb[33].mxu0  ;;  %v1375_v30 = vadd.f32 %v1374_v24, %v1174_v29 }
 0x4f8   :  { %1801 = vmatpush1.bf16.msra.mxu1 %v1800_v25  ;;  %v1402_v35 = vmax.f32 %v1375_v30, 0.0 }
 0x4f9   :  { %v1379_v14 = vpop.f32.mrb[34].mxu0  ;;  %1802 = vmatprep.subr.bf16.mxu1 %v1856_v39  ;;  %v1408_v39 = vld [vmem:[%s2590_s12 + $0x18] sm:$0xff] }
 0x4fa   :  { %v1380_v22 = vadd.f32 %v1379_v14, %v1179_v31  ;;  %v1381_v33 = vpop.f32.mrb[35].mxu0 }
 0x4fc   :  { %v1403_v37 = vmax.f32 %v1380_v22, 0.0 }
 0x4fd   :  { %v1384_v40 = vpop.f32.mrb[36].mxu0 }
 0x4fe   :  { %v1803_v41 = vpack.c.bf16 %v1403_v37, %v1402_v35  ;;  %v1385_v42 = vadd.f32 %v1384_v40, %v1184_v38  ;;  %v1386_v43 = vpop.f32.mrb[37].mxu0 }
 0x500   :  { %1804 = vmatpush1.bf16.msra.mxu1 %v1803_v41  ;;  %v1404_v23 = vmax.f32 %v1385_v42, 0.0 }
 0x501   :  { %1470 = vmatprep.subr.mxu1 %v1858_v32  ;;  %v1410_v32 = vld [vmem:[%s2590_s12 + $0x28] sm:$0x1] }
 0x504   :  { %1471 = vmatpush1.msra.mxu1 %v1404_v23 }
 0x505   :  { %1503 = vmatmul.mubr.f32.vlgmr.msra.gmra.mrb[42].mxu1 %v1405_v27 }
 0x506   :  { %1588 = vmatprep.mubr.msk.f32.mxu1 %vm1186_vm0, %v1408_v39 }
 0x509   :  { %1508 = vmatmul.mubr.f32.gmra.mrb[44].mxu1 %v1407_v45 }
 0x50a   :  { %1589 = vmatprep.mubr.msk.f32.mxu1 %vm1186_vm0, %v1410_v32 }
 0x50d   :  { %1513 = vmatmul.mubr.f32.gmra.mrb[46].mxu1 %v1409_v46 }
 0x5d8   :  { %v1504_v12 = vpop.f32.mrb[42].mxu1 }
 0x5d9   :  { %v1505_v47 = vadd.f32 %v1504_v12, %v1417_v28  ;;  %v1506_v21 = vpop.f32.mrb[43].mxu1 }
 0x5db   :  { %1518 = vst.msk [vmem:[%s2591_s14] sm:$0xff] %vm1186_vm0, %v1505_v47 }
 0x5dc   :  { %v1509_v49 = vpop.f32.mrb[44].mxu1 }
 0x5dd   :  { %v1510_v63 = vadd.f32 %v1509_v49, %v1422_v48  ;;  %v1511_v62 = vpop.f32.mrb[45].mxu1 }
 0x5df   :  { %1519 = vst.msk [vmem:[%s2591_s14 + $0x8] sm:$0xff] %vm1186_vm0, %v1510_v63 }
 0x5e0   :  { %v1514_v51 = vpop.f32.mrb[46].mxu1 }
 0x5e1   :  { %v1515_v53 = vadd.f32 %v1514_v51, %v1427_v50  ;;  %v1516_v54 = vpop.f32.mrb[47].mxu1 }
 0x5e3   :  { %1521 = vst.msk [vmem:[%s2591_s14 + $0x10] sm:$0x1] %vm1520_vm11, %v1515_v53 }

</bundles_post_ra>
